<compile_context>
chip_gen: v5e
topology: v5e:2x2
jax: 0.10.0
libtpu: 0.0.40
codegen_flags: <defaults>
</compile_context>

<pallas_src>
import jax
import jax.numpy as jnp
import numpy as np
from jax.experimental import pallas as pl
from jax.experimental.pallas import tpu as pltpu

LN_EPS = 1e-5

# Set to jnp.bfloat16 on v6e/v7x for ~2-4x MXU throughput on the big matmuls
# (accumulation stays f32; all softmax/LayerNorm/sigmoid math stays f32).
# Kept at f32 here so the numeric check against the f32 reference is exact.
MXU_DTYPE = jnp.float32

HW_TILE_CAP = 512                 # rows per HW tile
VMEM_LIMIT_BYTES = 48 * 1024 * 1024


def _round_up(v, m):
    return (v + m - 1) // m * m


def parallel_polarized_self_attention(x_nchw, params):
    """x_nchw: (B, C, H, W) float32.  Returns (B, C, H, W) float32."""
    B, C, H, W = x_nchw.shape
    C2 = C // 2
    HW = H * W
    Cp = _round_up(max(C, 1), 128)
    C2p = _round_up(max(C2, 1), 128)
    N1 = C2p + 128                    # fused [ch_wv | ch_wq] output width
    f32 = jnp.float32

    if HW <= HW_TILE_CAP:
        T = _round_up(HW, 8)
        HWp = T
    else:
        T = HW_TILE_CAP
        HWp = _round_up(HW, T)
    n_hw = HWp // T

    # NCHW -> (B, HW, C) channels-last (lane dim = C), zero-pad to (B, HWp, Cp).
    x = jnp.transpose(x_nchw, (0, 2, 3, 1)).reshape(B, HW, C).astype(f32)
    x_p = jnp.pad(x, ((0, 0), (0, HWp - HW), (0, Cp - C)))

    # ---------------- pack parameters into dense 128-aligned slabs ----------------
    w1 = jnp.zeros((Cp, N1), f32)
    w1 = w1.at[:C, :C2].set(params["ch_wv_w"].astype(f32))
    w1 = w1.at[:C, C2p].set(params["ch_wq_w"].astype(f32)[:, 0])

    b1 = jnp.zeros((1, N1), f32)
    b1 = b1.at[:, :C2].set(params["ch_wv_b"].astype(f32))
    b1 = b1.at[0, C2p].set(params["ch_wq_b"].astype(f32)[0, 0])

    wz_w = jnp.zeros((C2p, Cp), f32).at[:C2, :C].set(params["ch_wz_w"].astype(f32))
    wz_b = jnp.zeros((1, Cp), f32).at[:, :C].set(params["ch_wz_b"].astype(f32))
    ln_g = jnp.zeros((1, Cp), f32).at[:, :C].set(params["ln_g"].astype(f32))
    ln_b = jnp.zeros((1, Cp), f32).at[:, :C].set(params["ln_b"].astype(f32))
    spq_w = jnp.zeros((Cp, C2p), f32).at[:C, :C2].set(params["sp_wq_w"].astype(f32))
    spq_b = jnp.zeros((1, C2p), f32).at[:, :C2].set(params["sp_wq_b"].astype(f32))
    vec1 = jnp.concatenate([b1, wz_b, ln_g, ln_b, spq_b], axis=1)     # (1, N1+3Cp+C2p)

    w2 = jnp.zeros((Cp, C2p), f32).at[:C, :C2].set(params["sp_wv_w"].astype(f32))
    vec2 = jnp.zeros((1, C2p), f32).at[:, :C2].set(params["sp_wv_b"].astype(f32))

    # ---------------- pass 1: reduce (per-batch gate statistics) ----------------
    def reduce_kernel(x_ref, w1_ref, wz_ref, spqw_ref, vec_ref,
                      chw_ref, spq_ref, m_ref, l_ref, acc_ref, xsum_ref):
        t = pl.program_id(1)

        @pl.when(t == 0)
        def _():
            m_ref[...] = jnp.full_like(m_ref, -1e30)
            l_ref[...] = jnp.zeros_like(l_ref)
            acc_ref[...] = jnp.zeros_like(acc_ref)
            xsum_ref[...] = jnp.zeros_like(xsum_ref)

        x = x_ref[0]                                                    # (T, Cp)

        # fused 1x1 convs: [ch_wv | ch_wq] in a single MXU matmul
        y = jnp.dot(x.astype(MXU_DTYPE), w1_ref[...].astype(MXU_DTYPE),
                    preferred_element_type=jnp.float32) + vec_ref[:, 0:N1]
        wv = y[:, 0:C2p]                                                # (T, C2p)
        wq = y[:, C2p:C2p + 1]                                          # (T, 1)

        # mask zero-padded HW rows out of the softmax over HW
        row = jax.lax.broadcasted_iota(jnp.int32, (T, 1), 0) + t * T
        wq = jnp.where(row < HW, wq, -1e30)

        # online softmax over HW (channel-only branch)
        m_old = m_ref[...]                                              # (1, 1)
        m_new = jnp.maximum(m_old, jnp.max(wq, axis=0, keepdims=True))
        alpha = jnp.exp(m_old - m_new)
        p = jnp.exp(wq - m_new)                                         # (T, 1)
        l_ref[...] = alpha * l_ref[...] + jnp.sum(p, axis=0, keepdims=True)
        acc_ref[...] = alpha * acc_ref[...] + jnp.sum(wv * p, axis=0, keepdims=True)
        m_ref[...] = m_new

        # running spatial sum of x (mean-pool commutes with the 1x1 conv,
        # eliminating the sp_wq matmul entirely)
        xsum_ref[...] = xsum_ref[...] + jnp.sum(x, axis=0, keepdims=True)

        @pl.when(t == n_hw - 1)
        def _():
            lane_c = jax.lax.broadcasted_iota(jnp.int32, (1, Cp), 1)
            lane_c2 = jax.lax.broadcasted_iota(jnp.int32, (1, C2p), 1)

            # channel gate: softmax-weighted wv -> 1x1 conv -> LayerNorm -> sigmoid
            z = acc_ref[...] / l_ref[...]                               # (1, C2p)
            zc = jnp.dot(z, wz_ref[...], preferred_element_type=jnp.float32) \
                + vec_ref[:, N1:N1 + Cp]                                # (1, Cp)
            cmask = lane_c < C
            zc_m = jnp.where(cmask, zc, 0.0)
            mu = jnp.sum(zc_m, axis=-1, keepdims=True) / C
            var = jnp.sum(jnp.where(cmask, (zc - mu) ** 2, 0.0),
                          axis=-1, keepdims=True) / C
            ln = (zc - mu) * jax.lax.rsqrt(var + LN_EPS)
            ln = ln * vec_ref[:, N1 + Cp:N1 + 2 * Cp] \
                + vec_ref[:, N1 + 2 * Cp:N1 + 3 * Cp]
            chw_ref[0] = jax.nn.sigmoid(ln)                             # (1, Cp)

            # spatial softmax query from the pooled mean(x)
            xbar = xsum_ref[...] * (1.0 / HW)                           # (1, Cp)
            q = jnp.dot(xbar, spqw_ref[...], preferred_element_type=jnp.float32) \
                + vec_ref[:, N1 + 3 * Cp:N1 + 3 * Cp + C2p]             # (1, C2p)
            q = jnp.where(lane_c2 < C2, q, -1e30)
            q = jnp.exp(q - jnp.max(q, axis=-1, keepdims=True))
            spq_ref[0] = q / jnp.sum(q, axis=-1, keepdims=True)

    # ---------------- pass 2: apply gates ----------------
    def apply_kernel(x_ref, w2_ref, vec2_ref, chw_ref, spq_ref, out_ref):
        x = x_ref[0]                                                    # (T, Cp)
        sp_wv = jnp.dot(x.astype(MXU_DTYPE), w2_ref[...].astype(MXU_DTYPE),
                        preferred_element_type=jnp.float32) + vec2_ref[...]
        sp_wz = jnp.sum(sp_wv * spq_ref[0], axis=-1, keepdims=True)     # (T, 1)
        # fused gating: out = x * (channel_gate + spatial_gate)
        out_ref[0] = x * (chw_ref[0] + jax.nn.sigmoid(sp_wz))

    def full(arr):
        return pl.BlockSpec(arr.shape, lambda b, t, _nd=arr.ndim: (0,) * _nd)

    gates_chw, gates_spq = pl.pallas_call(
        reduce_kernel,
        out_shape=(jax.ShapeDtypeStruct((B, 1, Cp), f32),
                   jax.ShapeDtypeStruct((B, 1, C2p), f32)),
        grid_spec=pltpu.PrefetchScalarGridSpec(
            num_scalar_prefetch=0,
            grid=(B, n_hw),
            in_specs=[pl.BlockSpec((1, T, Cp), lambda b, t: (b, t, 0)),
                      full(w1), full(wz_w), full(spq_w), full(vec1)],
            out_specs=[pl.BlockSpec((1, 1, Cp), lambda b, t: (b, 0, 0)),
                       pl.BlockSpec((1, 1, C2p), lambda b, t: (b, 0, 0))],
            scratch_shapes=[pltpu.VMEM((1, 1), f32),       # running max
                            pltpu.VMEM((1, 1), f32),       # running denom
                            pltpu.VMEM((1, C2p), f32),     # running softmax-weighted wv
                            pltpu.VMEM((1, Cp), f32)]),    # running sum of x
        compiler_params=pltpu.CompilerParams(
            dimension_semantics=("parallel", "arbitrary"),
            vmem_limit_bytes=VMEM_LIMIT_BYTES),
    )(x_p, w1, wz_w, spq_w, vec1)

    y_p = pl.pallas_call(
        apply_kernel,
        out_shape=jax.ShapeDtypeStruct((B, HWp, Cp), f32),
        grid_spec=pltpu.PrefetchScalarGridSpec(
            num_scalar_prefetch=0,
            grid=(B, n_hw),
            in_specs=[pl.BlockSpec((1, T, Cp), lambda b, t: (b, t, 0)),
                      full(w2), full(vec2),
                      pl.BlockSpec((1, 1, Cp), lambda b, t: (b, 0, 0)),
                      pl.BlockSpec((1, 1, C2p), lambda b, t: (b, 0, 0))],
            out_specs=pl.BlockSpec((1, T, Cp), lambda b, t: (b, t, 0))),
        compiler_params=pltpu.CompilerParams(
            dimension_semantics=("parallel", "parallel"),
            vmem_limit_bytes=VMEM_LIMIT_BYTES),
    )(x_p, w2, vec2, gates_chw, gates_spq)

    y = y_p[:, :HW, :C].reshape(B, H, W, C)
    return jnp.transpose(y, (0, 3, 1, 2))


def reference_psa(x, p):
    """Pure-JAX NCHW reference mirroring the PyTorch forward exactly."""
    B, C, H, W = x.shape
    C2 = C // 2

    def conv1x1(x, w, b):  # w: (Cin, Cout), b: (1, Cout)
        return jnp.einsum('bchw,cd->bdhw', x, w) + b.reshape(1, -1, 1, 1)

    channel_wv = conv1x1(x, p['ch_wv_w'], p['ch_wv_b']).reshape(B, C2, -1)
    channel_wq = conv1x1(x, p['ch_wq_w'], p['ch_wq_b']).reshape(B, -1, 1)
    channel_wq = jax.nn.softmax(channel_wq, axis=1)
    channel_wz = jnp.matmul(channel_wv, channel_wq)[..., 0]          # (B, C2)
    zc = channel_wz @ p['ch_wz_w'] + p['ch_wz_b'].reshape(1, -1)     # (B, C)
    mu = zc.mean(-1, keepdims=True)
    var = ((zc - mu) ** 2).mean(-1, keepdims=True)
    ln = (zc - mu) / jnp.sqrt(var + LN_EPS)
    ln = ln * p['ln_g'].reshape(1, -1) + p['ln_b'].reshape(1, -1)
    channel_weight = jax.nn.sigmoid(ln).reshape(B, C, 1, 1)
    channel_out = channel_weight * x

    spatial_wv = conv1x1(x, p['sp_wv_w'], p['sp_wv_b']).reshape(B, C2, -1)
    spatial_wq = conv1x1(x, p['sp_wq_w'], p['sp_wq_b']).mean(axis=(2, 3))  # (B, C2)
    spatial_wq = jax.nn.softmax(spatial_wq, axis=-1).reshape(B, 1, C2)
    spatial_wz = jnp.matmul(spatial_wq, spatial_wv).reshape(B, 1, H, W)
    spatial_out = jax.nn.sigmoid(spatial_wz) * x
    return spatial_out + channel_out


def init_params(key, C):
    C2 = C // 2
    ks = jax.random.split(key, 12)
    scale = 0.1
    return {
        "ch_wv_w": scale * jax.random.normal(ks[0], (C, C2), jnp.float32),
        "ch_wv_b": scale * jax.random.normal(ks[1], (1, C2), jnp.float32),
        "ch_wq_w": scale * jax.random.normal(ks[2], (C, 1), jnp.float32),
        "ch_wq_b": scale * jax.random.normal(ks[3], (1, 1), jnp.float32),
        "ch_wz_w": scale * jax.random.normal(ks[4], (C2, C), jnp.float32),
        "ch_wz_b": scale * jax.random.normal(ks[5], (1, C), jnp.float32),
        "ln_g": 1.0 + scale * jax.random.normal(ks[6], (1, C), jnp.float32),
        "ln_b": scale * jax.random.normal(ks[7], (1, C), jnp.float32),
        "sp_wv_w": scale * jax.random.normal(ks[8], (C, C2), jnp.float32),
        "sp_wv_b": scale * jax.random.normal(ks[9], (1, C2), jnp.float32),
        "sp_wq_w": scale * jax.random.normal(ks[10], (C, C2), jnp.float32),
        "sp_wq_b": scale * jax.random.normal(ks[11], (1, C2), jnp.float32),
    }


if __name__ == "__main__":
    key = jax.random.PRNGKey(0)
    kx1, kx2, kp = jax.random.split(key, 3)

    # case 1: single HW tile (HW=256)
    B, C, H, W = 2, 16, 16, 16
    params = init_params(kp, C)
    x1 = jax.random.normal(kx1, (B, C, H, W), jnp.float32)
    out1 = jax.block_until_ready(parallel_polarized_self_attention(x1, params))
    ref1 = reference_psa(x1, params)
    np.testing.assert_allclose(np.asarray(out1), np.asarray(ref1), rtol=2e-3, atol=2e-3)
    assert out1.shape == (B, C, H, W)

    # case 2: multiple HW tiles + padded HW rows (HW=576 -> two 512-row tiles),
    # exercising the online-softmax reduction and row masking.
    H2, W2 = 24, 24
    x2 = jax.random.normal(kx2, (B, C, H2, W2), jnp.float32)
    out2 = jax.block_until_ready(parallel_polarized_self_attention(x2, params))
    ref2 = reference_psa(x2, params)
    np.testing.assert_allclose(np.asarray(out2), np.asarray(ref2), rtol=2e-3, atol=2e-3)
    assert out2.shape == (B, C, H2, W2)

    print("KERNEL_OK")
</pallas_src>

<mosaic_0001>
module attributes {stable_mosaic.version = 11 : i64} {
  func.func @reduce_kernel(%arg0: i32, %arg1: i32, %arg2: memref<1x256x128xf32, #tpu.memory_space<vmem>>, %arg3: memref<128x256xf32, #tpu.memory_space<vmem>>, %arg4: memref<128x128xf32, #tpu.memory_space<vmem>>, %arg5: memref<128x128xf32, #tpu.memory_space<vmem>>, %arg6: memref<1x768xf32, #tpu.memory_space<vmem>>, %arg7: memref<1x1x128xf32, #tpu.memory_space<vmem>>, %arg8: memref<1x1x128xf32, #tpu.memory_space<vmem>>, %arg9: memref<1x1xf32, #tpu.memory_space<vmem>>, %arg10: memref<1x1xf32, #tpu.memory_space<vmem>>, %arg11: memref<1x128xf32, #tpu.memory_space<vmem>>, %arg12: memref<1x128xf32, #tpu.memory_space<vmem>>) attributes {dimension_semantics = [#tpu.dimension_semantics<parallel>, #tpu.dimension_semantics<arbitrary>], iteration_bounds = array<i64: 2, 1>, scalar_prefetch = 0 : i64, scratch_operands = 4 : i64, tpu.core_type = #tpu.core_type<tc>, window_params = [{transform_indices = @transform_0, window_bounds = array<i64: 1, 256, 128>}, {pipeline_mode = #tpu.pipeline_mode<synchronous>, transform_indices = @transform_1, window_bounds = array<i64: 128, 256>}, {pipeline_mode = #tpu.pipeline_mode<synchronous>, transform_indices = @transform_2, window_bounds = array<i64: 128, 128>}, {pipeline_mode = #tpu.pipeline_mode<synchronous>, transform_indices = @transform_3, window_bounds = array<i64: 128, 128>}, {pipeline_mode = #tpu.pipeline_mode<synchronous>, transform_indices = @transform_4, window_bounds = array<i64: 1, 768>}, {transform_indices = @transform_5, window_bounds = array<i64: 1, 1, 128>}, {transform_indices = @transform_6, window_bounds = array<i64: 1, 1, 128>}]} {
    %c0_i32 = arith.constant 0 : i32
    %0 = arith.cmpi eq, %arg1, %c0_i32 : i32
    %1 = arith.extui %0 : i1 to i32
    %c0_i32_0 = arith.constant 0 : i32
    %2 = arith.cmpi ne, %1, %c0_i32_0 : i32
    scf.if %2 {
      %cst_31 = arith.constant -1.000000e+30 : f32
      %53 = vector.broadcast %cst_31 : f32 to vector<1x1xf32>
      %c0_32 = arith.constant 0 : index
      %c0_33 = arith.constant 0 : index
      %54 = vector.load %arg9[%c0_32, %c0_33] : memref<1x1xf32, #tpu.memory_space<vmem>>, vector<1x1xf32>
      tpu.vector_store %arg9[%c0_32, %c0_33], %53 {strides = array<i32>} : memref<1x1xf32, #tpu.memory_space<vmem>>, vector<1x1xf32>,
      %cst_34 = arith.constant 0.000000e+00 : f32
      %55 = vector.broadcast %cst_34 : f32 to vector<1x1xf32>
      %c0_35 = arith.constant 0 : index
      %c0_36 = arith.constant 0 : index
      %56 = vector.load %arg10[%c0_35, %c0_36] : memref<1x1xf32, #tpu.memory_space<vmem>>, vector<1x1xf32>
      tpu.vector_store %arg10[%c0_35, %c0_36], %55 {strides = array<i32>} : memref<1x1xf32, #tpu.memory_space<vmem>>, vector<1x1xf32>,
      %cst_37 = arith.constant 0.000000e+00 : f32
      %57 = vector.broadcast %cst_37 : f32 to vector<1x128xf32>
      %c0_38 = arith.constant 0 : index
      %c0_39 = arith.constant 0 : index
      %58 = vector.load %arg11[%c0_38, %c0_39] : memref<1x128xf32, #tpu.memory_space<vmem>>, vector<1x128xf32>
      tpu.vector_store %arg11[%c0_38, %c0_39], %57 {strides = array<i32>} : memref<1x128xf32, #tpu.memory_space<vmem>>, vector<1x128xf32>,
      %cst_40 = arith.constant 0.000000e+00 : f32
      %59 = vector.broadcast %cst_40 : f32 to vector<1x128xf32>
      %c0_41 = arith.constant 0 : index
      %c0_42 = arith.constant 0 : index
      %60 = vector.load %arg12[%c0_41, %c0_42] : memref<1x128xf32, #tpu.memory_space<vmem>>, vector<1x128xf32>
      tpu.vector_store %arg12[%c0_41, %c0_42], %59 {strides = array<i32>} : memref<1x128xf32, #tpu.memory_space<vmem>>, vector<1x128xf32>,
    } else {
    }
    %c0 = arith.constant 0 : index
    %c0_1 = arith.constant 0 : index
    %c0_2 = arith.constant 0 : index
    %3 = vector.load %arg2[%c0, %c0_1, %c0_2] : memref<1x256x128xf32, #tpu.memory_space<vmem>>, vector<1x256x128xf32>
    %4 = vector.shape_cast %3 : vector<1x256x128xf32> to vector<256x128xf32>
    %c0_3 = arith.constant 0 : index
    %c0_4 = arith.constant 0 : index
    %5 = vector.load %arg3[%c0_3, %c0_4] : memref<128x256xf32, #tpu.memory_space<vmem>>, vector<128x256xf32>
    %cst = arith.constant dense<0.000000e+00> : vector<256x256xf32>
    %6 = tpu.matmul %4, %5, %cst {dimension_numbers = #tpu.dot_dimension_numbers<[1], [0], [0], [1], [0, 0, 1, 1], [], []>} : vector<256x128xf32>, vector<128x256xf32>, vector<256x256xf32> -> vector<256x256xf32>
    %c0_5 = arith.constant 0 : index
    %c0_6 = arith.constant 0 : index
    %7 = vector.load %arg6[%c0_5, %c0_6] : memref<1x768xf32, #tpu.memory_space<vmem>>, vector<1x256xf32>
    %8 = vector.broadcast %7 : vector<1x256xf32> to vector<256x256xf32>
    %9 = arith.addf %6, %8 : vector<256x256xf32>
    %10 = vector.extract_strided_slice %9 {offsets = [0, 0], sizes = [256, 128], strides = [1, 1]} : vector<256x256xf32> to vector<256x128xf32>
    %11 = vector.extract_strided_slice %9 {offsets = [0, 128], sizes = [256, 1], strides = [1, 1]} : vector<256x256xf32> to vector<256x1xf32>
    %12 = tpu.iota {dimensions = array<i32: 0>} : vector<256x1xi32>
    %c256_i32 = arith.constant 256 : i32
    %13 = arith.muli %arg1, %c256_i32 : i32
    %14 = vector.broadcast %13 : i32 to vector<256x1xi32>
    %15 = arith.addi %12, %14 : vector<256x1xi32>
    %c256_i32_7 = arith.constant 256 : i32
    %16 = vector.broadcast %c256_i32_7 : i32 to vector<256x1xi32>
    %17 = arith.cmpi slt, %15, %16 : vector<256x1xi32>
    %cst_8 = arith.constant -1.000000e+30 : f32
    %18 = vector.broadcast %cst_8 : f32 to vector<256x1xf32>
    %19 = arith.select %17, %11, %18 : vector<256x1xi1>, vector<256x1xf32>
    %c0_9 = arith.constant 0 : index
    %c0_10 = arith.constant 0 : index
    %20 = vector.load %arg9[%c0_9, %c0_10] : memref<1x1xf32, #tpu.memory_space<vmem>>, vector<1x1xf32>
    %cst_11 = arith.constant dense<0xFF800000> : vector<1xf32>
    %21 = vector.multi_reduction <maximumf>, %19, %cst_11 [0] : vector<256x1xf32> to vector<1xf32>
    %22 = vector.shape_cast %21 : vector<1xf32> to vector<1x1xf32>
    %23 = arith.maximumf %20, %22 : vector<1x1xf32>
    %24 = arith.subf %20, %23 : vector<1x1xf32>
    %25 = math.exp %24 : vector<1x1xf32>
    %26 = vector.broadcast %23 : vector<1x1xf32> to vector<256x1xf32>
    %27 = arith.subf %19, %26 : vector<256x1xf32>
    %28 = math.exp %27 : vector<256x1xf32>
    %c0_12 = arith.constant 0 : index
    %c0_13 = arith.constant 0 : index
    %29 = vector.load %arg10[%c0_12, %c0_13] : memref<1x1xf32, #tpu.memory_space<vmem>>, vector<1x1xf32>
    %30 = arith.mulf %25, %29 : vector<1x1xf32>
    %cst_14 = arith.constant dense<0.000000e+00> : vector<1xf32>
    %31 = vector.multi_reduction <add>, %28, %cst_14 [0] : vector<256x1xf32> to vector<1xf32>
    %32 = vector.shape_cast %31 : vector<1xf32> to vector<1x1xf32>
    %33 = arith.addf %30, %32 : vector<1x1xf32>
    %c0_15 = arith.constant 0 : index
    %c0_16 = arith.constant 0 : index
    %34 = vector.load %arg10[%c0_15, %c0_16] : memref<1x1xf32, #tpu.memory_space<vmem>>, vector<1x1xf32>
    tpu.vector_store %arg10[%c0_15, %c0_16], %33 {strides = array<i32>} : memref<1x1xf32, #tpu.memory_space<vmem>>, vector<1x1xf32>,
    %c0_17 = arith.constant 0 : index
    %c0_18 = arith.constant 0 : index
    %35 = vector.load %arg11[%c0_17, %c0_18] : memref<1x128xf32, #tpu.memory_space<vmem>>, vector<1x128xf32>
    %36 = vector.broadcast %25 : vector<1x1xf32> to vector<1x128xf32>
    %37 = arith.mulf %36, %35 : vector<1x128xf32>
    %38 = vector.broadcast %28 : vector<256x1xf32> to vector<256x128xf32>
    %39 = arith.mulf %10, %38 : vector<256x128xf32>
    %cst_19 = arith.constant dense<0.000000e+00> : vector<128xf32>
    %40 = vector.multi_reduction <add>, %39, %cst_19 [0] : vector<256x128xf32> to vector<128xf32>
    %41 = vector.shape_cast %40 : vector<128xf32> to vector<1x128xf32>
    %42 = arith.addf %37, %41 : vector<1x128xf32>
    %c0_20 = arith.constant 0 : index
    %c0_21 = arith.constant 0 : index
    %43 = vector.load %arg11[%c0_20, %c0_21] : memref<1x128xf32, #tpu.memory_space<vmem>>, vector<1x128xf32>
    tpu.vector_store %arg11[%c0_20, %c0_21], %42 {strides = array<i32>} : memref<1x128xf32, #tpu.memory_space<vmem>>, vector<1x128xf32>,
    %c0_22 = arith.constant 0 : index
    %c0_23 = arith.constant 0 : index
    %44 = vector.load %arg9[%c0_22, %c0_23] : memref<1x1xf32, #tpu.memory_space<vmem>>, vector<1x1xf32>
    tpu.vector_store %arg9[%c0_22, %c0_23], %23 {strides = array<i32>} : memref<1x1xf32, #tpu.memory_space<vmem>>, vector<1x1xf32>,
    %c0_24 = arith.constant 0 : index
    %c0_25 = arith.constant 0 : index
    %45 = vector.load %arg12[%c0_24, %c0_25] : memref<1x128xf32, #tpu.memory_space<vmem>>, vector<1x128xf32>
    %cst_26 = arith.constant dense<0.000000e+00> : vector<128xf32>
    %46 = vector.multi_reduction <add>, %4, %cst_26 [0] : vector<256x128xf32> to vector<128xf32>
    %47 = vector.shape_cast %46 : vector<128xf32> to vector<1x128xf32>
    %48 = arith.addf %45, %47 : vector<1x128xf32>
    %c0_27 = arith.constant 0 : index
    %c0_28 = arith.constant 0 : index
    %49 = vector.load %arg12[%c0_27, %c0_28] : memref<1x128xf32, #tpu.memory_space<vmem>>, vector<1x128xf32>
    tpu.vector_store %arg12[%c0_27, %c0_28], %48 {strides = array<i32>} : memref<1x128xf32, #tpu.memory_space<vmem>>, vector<1x128xf32>,
    %c0_i32_29 = arith.constant 0 : i32
    %50 = arith.cmpi eq, %arg1, %c0_i32_29 : i32
    %51 = arith.extui %50 : i1 to i32
    %c0_i32_30 = arith.constant 0 : i32
    %52 = arith.cmpi ne, %51, %c0_i32_30 : i32
    scf.if %52 {
      %53 = tpu.iota {dimensions = array<i32: 1>} : vector<1x128xi32>
      %54 = tpu.iota {dimensions = array<i32: 1>} : vector<1x128xi32>
      %c0_31 = arith.constant 0 : index
      %c0_32 = arith.constant 0 : index
      %55 = vector.load %arg11[%c0_31, %c0_32] : memref<1x128xf32, #tpu.memory_space<vmem>>, vector<1x128xf32>
      %c0_33 = arith.constant 0 : index
      %c0_34 = arith.constant 0 : index
      %56 = vector.load %arg10[%c0_33, %c0_34] : memref<1x1xf32, #tpu.memory_space<vmem>>, vector<1x1xf32>
      %57 = vector.broadcast %56 : vector<1x1xf32> to vector<1x128xf32>
      %58 = arith.divf %55, %57 : vector<1x128xf32>
      %c0_35 = arith.constant 0 : index
      %c0_36 = arith.constant 0 : index
      %59 = vector.load %arg4[%c0_35, %c0_36] : memref<128x128xf32, #tpu.memory_space<vmem>>, vector<128x128xf32>
      %cst_37 = arith.constant dense<0.000000e+00> : vector<1x128xf32>
      %60 = tpu.matmul %58, %59, %cst_37 {dimension_numbers = #tpu.dot_dimension_numbers<[1], [0], [0], [1], [0, 0, 1, 1], [], []>} : vector<1x128xf32>, vector<128x128xf32>, vector<1x128xf32> -> vector<1x128xf32>
      %c0_38 = arith.constant 0 : index
      %c256 = arith.constant 256 : index
      %61 = vector.load %arg6[%c0_38, %c256] : memref<1x768xf32, #tpu.memory_space<vmem>>, vector<1x128xf32>
      %62 = arith.addf %60, %61 : vector<1x128xf32>
      %c16_i32 = arith.constant 16 : i32
      %63 = vector.broadcast %c16_i32 : i32 to vector<1x128xi32>
      %64 = arith.cmpi slt, %53, %63 : vector<1x128xi32>
      %cst_39 = arith.constant 0.000000e+00 : f32
      %65 = vector.broadcast %cst_39 : f32 to vector<1x128xf32>
      %66 = arith.select %64, %62, %65 : vector<1x128xi1>, vector<1x128xf32>
      %cst_40 = arith.constant dense<0.000000e+00> : vector<1xf32>
      %67 = vector.multi_reduction <add>, %66, %cst_40 [1] : vector<1x128xf32> to vector<1xf32>
      %68 = vector.shape_cast %67 : vector<1xf32> to vector<1x1xf32>
      %cst_41 = arith.constant 1.600000e+01 : f32
      %69 = vector.broadcast %cst_41 : f32 to vector<1x1xf32>
      %70 = arith.divf %68, %69 : vector<1x1xf32>
      %71 = vector.broadcast %70 : vector<1x1xf32> to vector<1x128xf32>
      %72 = arith.subf %62, %71 : vector<1x128xf32>
      %73 = arith.mulf %72, %72 : vector<1x128xf32>
      %cst_42 = arith.constant 0.000000e+00 : f32
      %74 = vector.broadcast %cst_42 : f32 to vector<1x128xf32>
      %75 = arith.select %64, %73, %74 : vector<1x128xi1>, vector<1x128xf32>
      %cst_43 = arith.constant dense<0.000000e+00> : vector<1xf32>
      %76 = vector.multi_reduction <add>, %75, %cst_43 [1] : vector<1x128xf32> to vector<1xf32>
      %77 = vector.shape_cast %76 : vector<1xf32> to vector<1x1xf32>
      %cst_44 = arith.constant 1.600000e+01 : f32
      %78 = vector.broadcast %cst_44 : f32 to vector<1x1xf32>
      %79 = arith.divf %77, %78 : vector<1x1xf32>
      %80 = vector.broadcast %70 : vector<1x1xf32> to vector<1x128xf32>
      %81 = arith.subf %62, %80 : vector<1x128xf32>
      %cst_45 = arith.constant 9.99999974E-6 : f32
      %82 = vector.broadcast %cst_45 : f32 to vector<1x1xf32>
      %83 = arith.addf %79, %82 : vector<1x1xf32>
      %84 = math.rsqrt %83 : vector<1x1xf32>
      %85 = vector.broadcast %84 : vector<1x1xf32> to vector<1x128xf32>
      %86 = arith.mulf %81, %85 : vector<1x128xf32>
      %c0_46 = arith.constant 0 : index
      %c384 = arith.constant 384 : index
      %87 = vector.load %arg6[%c0_46, %c384] : memref<1x768xf32, #tpu.memory_space<vmem>>, vector<1x128xf32>
      %88 = arith.mulf %86, %87 : vector<1x128xf32>
      %c0_47 = arith.constant 0 : index
      %c512 = arith.constant 512 : index
      %89 = vector.load %arg6[%c0_47, %c512] : memref<1x768xf32, #tpu.memory_space<vmem>>, vector<1x128xf32>
      %90 = arith.addf %88, %89 : vector<1x128xf32>
      %91 = arith.negf %90 : vector<1x128xf32>
      %92 = math.exp %91 : vector<1x128xf32>
      %cst_48 = arith.constant 1.000000e+00 : f32
      %93 = vector.broadcast %cst_48 : f32 to vector<1x128xf32>
      %94 = arith.addf %93, %92 : vector<1x128xf32>
      %95 = arith.divf %93, %94 : vector<1x128xf32>
      %c0_49 = arith.constant 0 : index
      %c0_50 = arith.constant 0 : index
      %c0_51 = arith.constant 0 : index
      %96 = vector.load %arg7[%c0_49, %c0_50, %c0_51] : memref<1x1x128xf32, #tpu.memory_space<vmem>>, vector<1x1x128xf32>
      %97 = vector.shape_cast %96 : vector<1x1x128xf32> to vector<1x128xf32>
      %98 = vector.shape_cast %95 : vector<1x128xf32> to vector<1x1x128xf32>
      tpu.vector_store %arg7[%c0_49, %c0_50, %c0_51], %98 {strides = array<i32>} : memref<1x1x128xf32, #tpu.memory_space<vmem>>, vector<1x1x128xf32>,
      %c0_52 = arith.constant 0 : index
      %c0_53 = arith.constant 0 : index
      %99 = vector.load %arg12[%c0_52, %c0_53] : memref<1x128xf32, #tpu.memory_space<vmem>>, vector<1x128xf32>
      %cst_54 = arith.constant 3.906250e-03 : f32
      %100 = vector.broadcast %cst_54 : f32 to vector<1x128xf32>
      %101 = arith.mulf %99, %100 : vector<1x128xf32>
      %c0_55 = arith.constant 0 : index
      %c0_56 = arith.constant 0 : index
      %102 = vector.load %arg5[%c0_55, %c0_56] : memref<128x128xf32, #tpu.memory_space<vmem>>, vector<128x128xf32>
      %cst_57 = arith.constant dense<0.000000e+00> : vector<1x128xf32>
      %103 = tpu.matmul %101, %102, %cst_57 {dimension_numbers = #tpu.dot_dimension_numbers<[1], [0], [0], [1], [0, 0, 1, 1], [], []>} : vector<1x128xf32>, vector<128x128xf32>, vector<1x128xf32> -> vector<1x128xf32>
      %c0_58 = arith.constant 0 : index
      %c640 = arith.constant 640 : index
      %104 = vector.load %arg6[%c0_58, %c640] : memref<1x768xf32, #tpu.memory_space<vmem>>, vector<1x128xf32>
      %105 = arith.addf %103, %104 : vector<1x128xf32>
      %c8_i32 = arith.constant 8 : i32
      %106 = vector.broadcast %c8_i32 : i32 to vector<1x128xi32>
      %107 = arith.cmpi slt, %54, %106 : vector<1x128xi32>
      %cst_59 = arith.constant -1.000000e+30 : f32
      %108 = vector.broadcast %cst_59 : f32 to vector<1x128xf32>
      %109 = arith.select %107, %105, %108 : vector<1x128xi1>, vector<1x128xf32>
      %cst_60 = arith.constant dense<0xFF800000> : vector<1xf32>
      %110 = vector.multi_reduction <maximumf>, %109, %cst_60 [1] : vector<1x128xf32> to vector<1xf32>
      %111 = vector.shape_cast %110 : vector<1xf32> to vector<1x1xf32>
      %112 = vector.broadcast %111 : vector<1x1xf32> to vector<1x128xf32>
      %113 = arith.subf %109, %112 : vector<1x128xf32>
      %114 = math.exp %113 : vector<1x128xf32>
      %cst_61 = arith.constant dense<0.000000e+00> : vector<1xf32>
      %115 = vector.multi_reduction <add>, %114, %cst_61 [1] : vector<1x128xf32> to vector<1xf32>
      %116 = vector.shape_cast %115 : vector<1xf32> to vector<1x1xf32>
      %117 = vector.broadcast %116 : vector<1x1xf32> to vector<1x128xf32>
      %118 = arith.divf %114, %117 : vector<1x128xf32>
      %c0_62 = arith.constant 0 : index
      %c0_63 = arith.constant 0 : index
      %c0_64 = arith.constant 0 : index
      %119 = vector.load %arg8[%c0_62, %c0_63, %c0_64] : memref<1x1x128xf32, #tpu.memory_space<vmem>>, vector<1x1x128xf32>
      %120 = vector.shape_cast %119 : vector<1x1x128xf32> to vector<1x128xf32>
      %121 = vector.shape_cast %118 : vector<1x128xf32> to vector<1x1x128xf32>
      tpu.vector_store %arg8[%c0_62, %c0_63, %c0_64], %121 {strides = array<i32>} : memref<1x1x128xf32, #tpu.memory_space<vmem>>, vector<1x1x128xf32>,
    } else {
    }
    return
  }
  func.func @transform_0(%arg0: i32, %arg1: i32) -> (i32, i32, i32) {
    %c0_i32 = arith.constant 0 : i32
    %c0_i32_0 = arith.constant 0 : i32
    return %arg0, %arg1, %c0_i32 : i32, i32, i32
  }
  func.func @transform_1(%arg0: i32, %arg1: i32) -> (i32, i32) {
    %c0_i32 = arith.constant 0 : i32
    %c0_i32_0 = arith.constant 0 : i32
    %c0_i32_1 = arith.constant 0 : i32
    return %c0_i32, %c0_i32_0 : i32, i32
  }
  func.func @transform_2(%arg0: i32, %arg1: i32) -> (i32, i32) {
    %c0_i32 = arith.constant 0 : i32
    %c0_i32_0 = arith.constant 0 : i32
    %c0_i32_1 = arith.constant 0 : i32
    return %c0_i32, %c0_i32_0 : i32, i32
  }
  func.func @transform_3(%arg0: i32, %arg1: i32) -> (i32, i32) {
    %c0_i32 = arith.constant 0 : i32
    %c0_i32_0 = arith.constant 0 : i32
    %c0_i32_1 = arith.constant 0 : i32
    return %c0_i32, %c0_i32_0 : i32, i32
  }
  func.func @transform_4(%arg0: i32, %arg1: i32) -> (i32, i32) {
    %c0_i32 = arith.constant 0 : i32
    %c0_i32_0 = arith.constant 0 : i32
    %c0_i32_1 = arith.constant 0 : i32
    return %c0_i32, %c0_i32_0 : i32, i32
  }
  func.func @transform_5(%arg0: i32, %arg1: i32) -> (i32, i32, i32) {
    %c0_i32 = arith.constant 0 : i32
    %c0_i32_0 = arith.constant 0 : i32
    %c0_i32_1 = arith.constant 0 : i32
    return %arg0, %c0_i32, %c0_i32_0 : i32, i32, i32
  }
  func.func @transform_6(%arg0: i32, %arg1: i32) -> (i32, i32, i32) {
    %c0_i32 = arith.constant 0 : i32
    %c0_i32_0 = arith.constant 0 : i32
    %c0_i32_1 = arith.constant 0 : i32
    return %arg0, %c0_i32, %c0_i32_0 : i32, i32, i32
  }
}

</mosaic_0001>

<bundles_post_ra>
// kernel: tpu_custom_call.1
= control target key start
LH: loop header
LB: loop body
LE: loop exit
PB: predicated region body
PF: predicated region fallthrough
CT: control target
= control target key end

     0   :  { %s3155_s0 = inlined_call_operand.hbm [shape: f32[2,256,128], index: 0, kind: input, shape index: {}]   ;;  %s3156_s1 = inlined_call_operand.hbm [shape: f32[128,256], index: 1, kind: input, shape index: {}]   ;;  %s3157_s2 = inlined_call_operand.hbm [shape: f32[128,128], index: 2, kind: input, shape index: {}]   ;;  %s3158_s3 = inlined_call_operand.hbm [shape: f32[128,128], index: 3, kind: input, shape index: {}]   ;;  %s3159_s4 = inlined_call_operand.hbm [shape: f32[1,768], index: 4, kind: input, shape index: {}]   ;;  %s3160_s5 = inlined_call_operand.hbm [shape: f32[2,1,128], index: 5, kind: output, shape index: {0}]   ;;  %s3161_s6 = inlined_call_operand.hbm [shape: f32[2,1,128], index: 6, kind: output, shape index: {1}]  }
   0x1   :  { %3165 = sst [smem:[#allocation23_spill]] %s3156_s1 }
   0x2   :  { %3166 = sst [smem:[#allocation24_spill]] %s3157_s2 }
   0x3   :  { %3167 = sst [smem:[#allocation25_spill]] %s3158_s3 }
   0x4   :  { %12 = vsyncpa [#allocation7], 0 }
   0x5   :  { %14 = vsyncpa [#allocation7 + $0x1], 0 }
   0x6   :  { %15 = vsyncpa [#allocation10], 0 }
   0x7   :  { %16 = vsyncpa [#allocation13], 0 }
   0x8   :  { %17 = vsyncpa [#allocation8], 0 }
   0x9   :  { %19 = vsyncpa [#allocation8 + $0x1], 0 }
   0xa   :  { %20 = vsyncpa [#allocation17], 0 }
   0xb   :  { %22 = vsyncpa [#allocation17 + $0x1], 0  ;;  %s2260_s21 = smov 0   ;;  %s2262_s22 = smov 0  }
   0xc   :  { %s2264_s23 = smov 0   ;;  %s2266_s24 = smov 0  }
   0xd   :  { %s2268_s25 = smov 0   ;;  %s2270_s26 = smov 0  }
   0xe LB: > { %s3162_s27 = sadd.s32 4294967295, %s2211_s26   ;;  %s1688_s28 = sadd.s32 4294967294, %s2211_s26   ;;  %s2211_s26 = sphi %s2270_s26, %s28_s26   ;;  %s2207_s25 = sphi %s2268_s25, %s3184_s25   ;;  %s2203_s24 = sphi %s2266_s24, %s3183_s24   ;;  %s2199_s23 = sphi %s2264_s23, %s3182_s23   ;;  %s2195_s22 = sphi %s2262_s22, %s3181_s22   ;;  %s2191_s21 = sphi %s2260_s21, %s3180_s21  }
   0xf   : > { %p62_p0 = scmp.ne.s32.totalorder %s2195_s22, %s2191_s21  ;;  %p2296_p1 = scmp.eq.s32.totalorder %s3162_s27, 0 }
  0x10   : > { %p176_p2 = scmp.eq.s32.totalorder %s1688_s28, 1  ;;  %p1689_p4 = scmp.ge.s32.totalorder %s2211_s26, 1 }
  0x11   : > { %p2302_p3 = por %p2296_p1, %p62_p0  ;;  %p209_p6 = scmp.lt.s32.totalorder %s2211_s26, 3 }
  0x12   : > { %p2307_p5 = por %p176_p2, %p62_p0  ;;  %s3171_s1 = sld [smem:[#allocation23_spill]] }
  0x13   : > { %p2315_p7 = pnand %p1689_p4, %p209_p6  ;;  %s2213_s12 = smov [#allocation9]  }
  0x14   : > { %s222_s13 = sshll.u32 %s2213_s12, 4  ;;  %p1694_p10 = scmp.ge.s32.totalorder %s2211_s26, 2  ;;  %s223_s13 = int_to_ptr.vmem [resolvable:$true] %s222_s13 }
  0x15   : > { %p1762_p8 = pneg %p2315_p7  ;;  %s3174_s3 = sld [smem:[#allocation25_spill]] }
  0x16   : > { %s2214_s18 = smov 256   ;;  %s2215_s19 = smov 16  }
  0x17   : > { %p2323_p9 = pnand %p1762_p8, %p2296_p1  ;;  %s2216_s20 = smov [#allocation12]  }
  0x18   : > { %s220_s10 = sshll.u32 %s3171_s1, 4  ;;  %s250_s28 = sshll.u32 %s2216_s20, 4  ;;  %s221_s10 = int_to_ptr.hbm [resolvable:$true] %s220_s10  ;;  %s251_s28 = int_to_ptr.vmem [resolvable:$true] %s250_s28 }
  0x19   : > { %1765 = dma.hbm_to_vmem [thread:$0]  (!%p2323_p9), %s221_s10, 4096, %s223_s13, [#allocation10], %s2214_s18, %s2214_s18, %s2215_s19  }
  0x1a   : > { %s3175_s2 = sld [smem:[#allocation24_spill]]  ;;  %s3163_s27 = smov 128  }
  0x1b   : > { %s248_s17 = sshll.u32 %s3174_s3, 4  ;;  %s3164_s15 = smov 8   ;;  %s249_s17 = int_to_ptr.hbm [resolvable:$true] %s248_s17 }
  0x1c   : > { %1771 = dma.hbm_to_vmem [thread:$0]  (!%p2323_p9), %s249_s17, 2048, %s251_s28, [#allocation13], %s3163_s27, %s3163_s27, %s3164_s15  }
  0x1d   : > { %s263_s16 = sshll.u32 %s3159_s4, 4  ;;  %s2219_s18 = smov [#allocation11]   ;;  %s264_s16 = int_to_ptr.hbm [resolvable:$true] %s263_s16 }
  0x1e   : > { %s236_s19 = sshll.u32 %s2219_s18, 4  ;;  %s2220_s20 = smov [#allocation14]   ;;  %s237_s19 = int_to_ptr.vmem [resolvable:$true] %s236_s19 }
  0x1f   : > { %s265_s8 = sshll.u32 %s2220_s20, 4  ;;  %s3176_s17 = sadd.s32 4294967295, %s2211_s26   ;;  %s266_s8 = int_to_ptr.vmem [resolvable:$true] %s265_s8 }
  0x20   : > { %s234_s12 = sshll.u32 %s3175_s2, 4  ;;  %p170_p11 = scmp.eq.s32.totalorder %s3176_s17, 1  ;;  %s235_s12 = int_to_ptr.hbm [resolvable:$true] %s234_s12 }
  0x21   : > { %1768 = dma.hbm_to_vmem [thread:$0]  (!%p2323_p9), %s235_s12, 2048, %s237_s19, [#allocation10], %s3163_s27, %s3163_s27, %s3164_s15  }
  0x22   : > { %1774 = dma.hbm_to_vmem [thread:$0]  (!%p2323_p9), %s264_s16, 96, %s266_s8, [#allocation13]  }
  0x23   : > { %s40_s28 = sadd.s32 1, %s2207_s25  ;;  %s49_s9 = sadd.s32 1, %s2199_s23 }
  0x24   : > { %p42_p12 = scmp.ge.s32.totalorder %s40_s28, 2  ;;  %p56_p13 = scmp.ne.s32.totalorder %s2199_s23, %s2195_s22 }
  0x25   : > { %p57_p0 = scmp.eq.s32.totalorder %s2211_s26, 0  ;;  %p1790_p4 = scmp.lt.s32.totalorder %s2211_s26, 2 }
  0x26   : > { %s3186_s28 = smov (%p42_p12, %s40_s28), 0  ;;  %p2360_p2 = por %p170_p11, %p56_p13 }
  0x27   : > { %s44_s14 = ssub.s32 %s2207_s25, %s3186_s28  ;;  %s276_s10 = sand.u32 1, %s2199_s23  }
  0x28   : > { %p47_p6 = scmp.eq.s32.totalorder %s44_s14, 0  ;;  %p58_p8 = por %p57_p0, %p56_p13 }
  0x29   : > { %s1695_s13 = sshll.u32 %s276_s10, 8  ;;  %s1707_s16 = sshll.u32 %s2207_s25, 8 }
  0x2a   : > { %s2370_s18 = scalar_select %p47_p6, %s2199_s23, %s49_s9  }
  0x2b   : > { %s287_s8 = scalar_lea.hbm %s3155_s0, %s1707_s16  ;;  %s280_s27 = scalar_lea.vmem [#allocation6], %s1695_s13 }
  0x2c   : > { %s288_s17 = sshll.u32 %s287_s8, 4  ;;  %s290_s15 = sshll.u32 %s280_s27, 4  ;;  %s289_s17 = int_to_ptr.hbm [resolvable:$true] %s288_s17  ;;  %s291_s15 = int_to_ptr.vmem [resolvable:$true] %s290_s15 }
  0x2d   : > { %p1776_p9 = pnand %p1790_p4, %p58_p8  ;;  %s277_s1 = scalar_lea.sflag [#allocation7], %s276_s10 }
  0x2e   : > { %s3178_s2 = smov 8   ;;  %s3179_s3 = smov 128  }
  0x2f   : > { %1778 = dma.hbm_to_vmem [thread:$0]  (!%p1776_p9), %s289_s17, 4096, %s291_s15, %s277_s1, %s3179_s3, %s3179_s3, %s3178_s2  }
  0x30   : > { %302 = sbr.rel (%p2315_p7) target bundleno = 1041 (0x411), region = 40  ;;  %s2383_s9 = sand.u32 (!%p2315_p7), 1, %s2195_s22  }
  0x31   : > { %s1699_s14 = sshll.u32 (!%p2315_p7), %s2383_s9, 8  ;;  %s305_s27 = scalar_lea.sflag (!%p2315_p7), [#allocation7], %s2383_s9 }
  0x32   : > { %s2387_s13 = scalar_lea.vmem (!%p2315_p7), [#allocation6], %s1699_s14 }
  0x35   : > { %2170 = dma.done.wait (%p2302_p3), %s305_s27, 4096  }
  0x36   : > { %2172 = vsyncadd (%p2302_p3), %s305_s27, 4294963200 }
  0x37   : > { %2174 = dma.done.wait (%p2296_p1), [#allocation10], 6144  }
  0x38   : > { %2176 = vsyncadd (%p2296_p1), [#allocation10], 4294961152 }
  0x39   : > { %2178 = dma.done.wait (%p2296_p1), [#allocation13], 2144  }
  0x3a   : > { %2180 = vsyncadd (%p2296_p1), [#allocation13], 4294965152  ;;  %v434_v0 = vld [vmem:[#allocation9 + $0xf8] sm:$0xff]  ;;  %v432_v1 = vld [vmem:[#allocation9 + $0xe8] sm:$0xff]  ;;  %v2221_v62 = vmov 0.0   ;;  %vm799_vm0 = vcmask 7168   ;;  %s1540_s29 = scalar_lea.hbm %s3161_s6, %s2203_s24 }
  0x3b   : > { %554 = vmatpush.msra.mxu1 %v434_v0  ;;  %1724 = vmatpush.msra.mxu3 %v434_v0  ;;  %v430_v2 = vld [vmem:[#allocation9 + $0xd8] sm:$0xff]  ;;  %v428_v3 = vld [vmem:[#allocation9 + $0xc8] sm:$0xff]  ;;  %v2402_v16 = vld [vmem:[%s2387_s13] sm:$0xff]  ;;  %370 = vst [vmem:[#allocation5] sm:$0x1] %v2221_v62  ;;  %vm366_vm1 = vcmask 0  }
  0x3c   : > { %v426_v4 = vld [vmem:[#allocation9 + $0xb8] sm:$0xff]  ;;  %v424_v5 = vld [vmem:[#allocation9 + $0xa8] sm:$0xff]  ;;  %v2413_v19 = vld [vmem:[%s2387_s13 + $0x90] sm:$0xff]  ;;  %369 = vst [vmem:[#allocation4] sm:$0x1] %v2221_v62  ;;  %vm1393_vm3 = vcmask 1040384  }
  0x3d   : > { %555 = vmatpush.msra.mxu1 %v432_v1  ;;  %1725 = vmatpush.msra.mxu3 %v432_v1  ;;  %v422_v6 = vld [vmem:[#allocation9 + $0x98] sm:$0xff]  ;;  %v420_v7 = vld [vmem:[#allocation9 + $0x88] sm:$0xff]  ;;  %v2418_v20 = vld [vmem:[%s2387_s13 + $0x10] sm:$0xff]  ;;  %368 = vst.msk [vmem:[#allocation3] sm:$0x1] %vm366_vm1, %v2221_v62  ;;  %s360_s1 = scalar_lea.vmem [#allocation16], %s2383_s9 }
  0x3e   : > { %v418_v8 = vld [vmem:[#allocation9 + $0x78] sm:$0xff]  ;;  %v416_v9 = vld [vmem:[#allocation9 + $0x68] sm:$0xff]  ;;  %v2429_v23 = vld [vmem:[%s2387_s13 + $0xa0] sm:$0xff]  ;;  %s1542_s30 = sshll.u32 %s360_s1, 4  ;;  %s1544_s11 = sshll.u32 %s1540_s29, 4  ;;  %s1543_s30 = int_to_ptr.vmem [resolvable:$true] %s1542_s30  ;;  %s1545_s11 = int_to_ptr.hbm [resolvable:$true] %s1544_s11 }
  0x3f   : > { %556 = vmatpush.msra.mxu1 %v430_v2  ;;  %1726 = vmatpush.msra.mxu3 %v430_v2  ;;  %v414_v10 = vld [vmem:[#allocation9 + $0x58] sm:$0xff]  ;;  %v412_v11 = vld [vmem:[#allocation9 + $0x48] sm:$0xff]  ;;  %v2434_v24 = vld [vmem:[%s2387_s13 + $0x20] sm:$0xff]  ;;  %s1519_s15 = scalar_lea.sflag [#allocation17], %s2383_s9  ;;  %s2103_s10 = sshra.s32 %s1545_s11, 4  ;;  %s2104_s10 = int_to_ptr.hbm [resolvable:$true] %s2103_s10 }
  0x40   : > { %v410_v12 = vld [vmem:[#allocation9 + $0x38] sm:$0xff]  ;;  %v408_v13 = vld [vmem:[#allocation9 + $0x28] sm:$0xff]  ;;  %v2447_v28 = vld [vmem:[%s2387_s13 + $0xb0] sm:$0xff]  ;;  %s2105_s16 = scalar_lea.hbm %s2104_s10, 1  ;;  %s2109_s8 = scalar_lea.hbm %s3161_s6, 2 }
  0x41   : > { %557 = vmatpush.msra.mxu1 %v428_v3  ;;  %1727 = vmatpush.msra.mxu3 %v428_v3  ;;  %v406_v14 = vld [vmem:[#allocation9 + $0x18] sm:$0xff]  ;;  %v404_v15 = vld [vmem:[#allocation9 + $0x8] sm:$0xff]  ;;  %v2454_v31 = vld [vmem:[%s2387_s13 + $0x30] sm:$0xff]  ;;  %p2106_p1 = scmp.ne.s32.totalorder %s2104_s10, %s2105_s16  ;;  %p2110_p11 = scmp.lt.s32.totalorder %s2104_s10, %s3161_s6 }
  0x42   : > { %v2405_v17 = vld [vmem:[%s2387_s13 + $0x88] sm:$0xff]  ;;  %v2421_v21 = vld [vmem:[%s2387_s13 + $0x98] sm:$0xff]  ;;  %v2467_v36 = vld [vmem:[%s2387_s13 + $0xc0] sm:$0xff]  ;;  %p2111_p12 = scmp.lt.s32.totalorder %s2109_s8, %s2105_s16 }
  0x43   : > { %558 = vmatpush.msra.mxu1 %v426_v4  ;;  %1728 = vmatpush.msra.mxu3 %v426_v4  ;;  %v2410_v18 = vld [vmem:[%s2387_s13 + $0x8] sm:$0xff]  ;;  %v2426_v22 = vld [vmem:[%s2387_s13 + $0x18] sm:$0xff]  ;;  %v2474_v39 = vld [vmem:[%s2387_s13 + $0x40] sm:$0xff]  ;;  %p2107_p3 = pnand %p2106_p1, %p2360_p2 }
  0x44   : > { %v2437_v25 = vld [vmem:[%s2387_s13 + $0xa8] sm:$0xff]  ;;  %v1287_v26 = vadd.f32 %v2410_v18, %v2402_v16  ;;  %v2457_v32 = vld [vmem:[%s2387_s13 + $0xb8] sm:$0xff]  ;;  %v2487_v44 = vld [vmem:[%s2387_s13 + $0xd0] sm:$0xff]  ;;  %p2112_p13 = por %p2111_p12, %p2110_p11 }
  0x45   : > { %559 = vmatpush.msra.mxu1 %v424_v5  ;;  %1729 = vmatpush.msra.mxu3 %v424_v5  ;;  %v2444_v27 = vld [vmem:[%s2387_s13 + $0x28] sm:$0xff]  ;;  %v2464_v35 = vld [vmem:[%s2387_s13 + $0x38] sm:$0xff]  ;;  %v2490_v45 = vld [vmem:[%s2387_s13 + $0x50] sm:$0xff]  ;;  %p2108_p7 = pneg %p2107_p3 }
  0x46   : > { %v1288_v29 = vadd.f32 %v1287_v26, %v2418_v20  ;;  %v2477_v40 = vld [vmem:[%s2387_s13 + $0xc8] sm:$0xff]  ;;  %v2496_v47 = vld [vmem:[%s2387_s13 + $0x58] sm:$0xff]  ;;  %v2503_v50 = vld [vmem:[%s2387_s13 + $0x60] sm:$0xff] }
  0x47   : > { %560 = vmatpush.msra.mxu1 %v422_v6  ;;  %1730 = vmatpush.msra.mxu3 %v422_v6  ;;  %v2483_v42 = vld [vmem:[%s2387_s13 + $0x48] sm:$0xff]  ;;  %v2500_v49 = vld [vmem:[%s2387_s13 + $0xd8] sm:$0xff]  ;;  %v2513_v54 = vld [vmem:[%s2387_s13 + $0xe0] sm:$0xff]  ;;  %p2113_p0 = pnand %p2112_p13, %p2108_p7 }
  0x48   : > { %v1289_v30 = vadd.f32 %v1288_v29, %v2426_v22  ;;  %v2509_v52 = vld [vmem:[%s2387_s13 + $0x68] sm:$0xff]  ;;  %v2516_v55 = vld [vmem:[%s2387_s13 + $0x70] sm:$0xff]  ;;  %v2522_v57 = vld [vmem:[%s2387_s13 + $0x78] sm:$0xff] }
  0x49   : > { %561 = vmatpush.msra.mxu1 %v420_v7  ;;  %1731 = vmatpush.msra.mxu3 %v420_v7  ;;  %v2526_v59 = vld [vmem:[%s2387_s13 + $0xe8] sm:$0xff]  ;;  %v2529_v60 = vld [vmem:[%s2387_s13 + $0x80] sm:$0xff]  ;;  %v2539_v1 = vld [vmem:[%s2387_s13 + $0xf0] sm:$0xff] }
  0x4a   : > { %v1290_v33 = vadd.f32 %v1289_v30, %v2434_v24  ;;  %v2548_v6 = vld [vmem:[%s2387_s13 + $0xf8] sm:$0xff]  ;;  %v433_v7 = vld [vmem:[#allocation9 + $0xf0] sm:$0xff]  ;;  %v423_v29 = vld [vmem:[#allocation9 + $0xa0] sm:$0xff] }
  0x4b   : > { %562 = vmatpush.msra.mxu1 %v418_v8  ;;  %1732 = vmatpush.msra.mxu3 %v418_v8 }
  0x4c   : > { %v1291_v34 = vadd.f32 %v1290_v33, %v2444_v27  ;;  %441 = vmatpush.msra.mxu0 %v433_v7  ;;  %1708 = vmatpush.msra.mxu2 %v433_v7  ;;  %v421_v33 = vld [vmem:[#allocation9 + $0x90] sm:$0xff]  ;;  %v1286_v7 = vld [vmem:[#allocation5] sm:$0x1] }
  0x4d   : > { %563 = vmatpush.msra.mxu1 %v416_v9  ;;  %1733 = vmatpush.msra.mxu3 %v416_v9  ;;  %v431_v9 = vld [vmem:[#allocation9 + $0xe0] sm:$0xff] }
  0x4e   : > { %v1292_v37 = vadd.f32 %v1291_v34, %v2454_v31  ;;  %442 = vmatpush.msra.mxu0 %v431_v9  ;;  %1709 = vmatpush.msra.mxu2 %v431_v9 }
  0x4f   : > { %564 = vmatpush.msra.mxu1 %v414_v10  ;;  %1734 = vmatpush.msra.mxu3 %v414_v10 }
  0x50   : > { %v1293_v38 = vadd.f32 %v1292_v37, %v2464_v35  ;;  %v419_v37 = vld [vmem:[#allocation9 + $0x80] sm:$0xff] }
  0x51   : > { %565 = vmatpush.msra.mxu1 %v412_v11  ;;  %1735 = vmatpush.msra.mxu3 %v412_v11  ;;  %v429_v11 = vld [vmem:[#allocation9 + $0xd0] sm:$0xff] }
  0x52   : > { %v1294_v41 = vadd.f32 %v1293_v38, %v2474_v39  ;;  %443 = vmatpush.msra.mxu0 %v429_v11  ;;  %1710 = vmatpush.msra.mxu2 %v429_v11  ;;  %v403_v11 = vld [vmem:[#allocation9] sm:$0xff] }
  0x53   : > { %566 = vmatpush.msra.mxu1 %v410_v12  ;;  %1736 = vmatpush.msra.mxu3 %v410_v12 }
  0x54   : > { %v1295_v43 = vadd.f32 %v1294_v41, %v2483_v42 }
  0x55   : > { %567 = vmatpush.msra.mxu1 %v408_v13  ;;  %1737 = vmatpush.msra.mxu3 %v408_v13  ;;  %v427_v13 = vld [vmem:[#allocation9 + $0xc0] sm:$0xff] }
  0x56   : > { %v1296_v46 = vadd.f32 %v1295_v43, %v2490_v45  ;;  %444 = vmatpush.msra.mxu0 %v427_v13  ;;  %1711 = vmatpush.msra.mxu2 %v427_v13  ;;  %v417_v43 = vld [vmem:[#allocation9 + $0x70] sm:$0xff] }
  0x57   : > { %568 = vmatpush.msra.mxu1 %v406_v14  ;;  %1738 = vmatpush.msra.mxu3 %v406_v14 }
  0x58   : > { %v1297_v48 = vadd.f32 %v1296_v46, %v2496_v47 }
  0x59   : > { %569 = vmatpush.msra.mxu1 %v404_v15  ;;  %1739 = vmatpush.msra.mxu3 %v404_v15  ;;  %v425_v15 = vld [vmem:[#allocation9 + $0xb0] sm:$0xff] }
  0x5a   : > { %570 = vmatmul.f32.vlgmr.msra.gmra.mxu1 %v2402_v16  ;;  %621 = vmatmul.f32.vlgmr.msra.gmra.mxu3 %v2405_v17  ;;  %v1298_v51 = vadd.f32 %v1297_v48, %v2503_v50  ;;  %v415_v48 = vld [vmem:[#allocation9 + $0x60] sm:$0xff] }
  0x5b   : > { %445 = vmatpush.msra.mxu0 %v425_v15  ;;  %1712 = vmatpush.msra.mxu2 %v425_v15  ;;  %v2569_v15 = vld [vmem:[#allocation14] sm:$0x3] }
  0x5c   : > { %v1299_v53 = vadd.f32 %v1298_v51, %v2509_v52 }
  0x5d   : > { %446 = vmatpush.msra.mxu0 %v423_v29  ;;  %1713 = vmatpush.msra.mxu2 %v423_v29  ;;  %v2574_v29 = vperm.slane %v2569_v15, 1 }
  0x5e   : > { %v1300_v56 = vadd.f32 %v1299_v53, %v2516_v55  ;;  %v413_v53 = vld [vmem:[#allocation9 + $0x50] sm:$0xff] }
  0x5f   : > { %447 = vmatpush.msra.mxu0 %v421_v33  ;;  %1714 = vmatpush.msra.mxu2 %v421_v33 }
  0x60   : > { %v1301_v58 = vadd.f32 %v1300_v56, %v2522_v57 }
  0x61   : > { %448 = vmatpush.msra.mxu0 %v419_v37  ;;  %1715 = vmatpush.msra.mxu2 %v419_v37 }
  0x62   : > { %573 = vmatmul.f32.gmra.mxu1 %v2410_v18  ;;  %624 = vmatmul.f32.gmra.mxu3 %v2413_v19  ;;  %v1302_v61 = vadd.f32 %v1301_v58, %v2529_v60 }
  0x63   : > { %449 = vmatpush.msra.mxu0 %v417_v43  ;;  %1716 = vmatpush.msra.mxu2 %v417_v43 }
  0x64   : > { %v1303_v63 = vadd.f32 %v1302_v61, %v2405_v17  ;;  %v411_v61 = vld [vmem:[#allocation9 + $0x40] sm:$0xff] }
  0x65   : > { %450 = vmatpush.msra.mxu0 %v415_v48  ;;  %1717 = vmatpush.msra.mxu2 %v415_v48 }
  0x66   : > { %v1304_v0 = vadd.f32 %v1303_v63, %v2413_v19 }
  0x67   : > { %451 = vmatpush.msra.mxu0 %v413_v53  ;;  %1718 = vmatpush.msra.mxu2 %v413_v53 }
  0x68   : > { %v1305_v2 = vadd.f32 %v1304_v0, %v2421_v21 }
  0x69   : > { %452 = vmatpush.msra.mxu0 %v411_v61  ;;  %1719 = vmatpush.msra.mxu2 %v411_v61 }
  0x6a   : > { %576 = vmatmul.f32.gmra.mxu1 %v2418_v20  ;;  %627 = vmatmul.f32.gmra.mxu3 %v2421_v21  ;;  %v1306_v3 = vadd.f32 %v1305_v2, %v2429_v23  ;;  %v409_v2 = vld [vmem:[#allocation9 + $0x30] sm:$0xff] }
  0x6b   : > { %453 = vmatpush.msra.mxu0 %v409_v2  ;;  %1720 = vmatpush.msra.mxu2 %v409_v2 }
  0x6c   : > { %v1307_v4 = vadd.f32 %v1306_v3, %v2437_v25 }
  0x6e   : > { %v1308_v5 = vadd.f32 %v1307_v4, %v2447_v28  ;;  %v407_v4 = vld [vmem:[#allocation9 + $0x20] sm:$0xff] }
  0x6f   : > { %454 = vmatpush.msra.mxu0 %v407_v4  ;;  %1721 = vmatpush.msra.mxu2 %v407_v4 }
  0x70   : > { %v1309_v8 = vadd.f32 %v1308_v5, %v2457_v32 }
  0x72   : > { %579 = vmatmul.f32.gmra.mxu1 %v2426_v22  ;;  %630 = vmatmul.f32.gmra.mxu3 %v2429_v23  ;;  %v1310_v10 = vadd.f32 %v1309_v8, %v2467_v36  ;;  %v405_v8 = vld [vmem:[#allocation9 + $0x10] sm:$0xff] }
  0x73   : > { %455 = vmatpush.msra.mxu0 %v405_v8  ;;  %1722 = vmatpush.msra.mxu2 %v405_v8 }
  0x74   : > { %v1311_v12 = vadd.f32 %v1310_v10, %v2477_v40 }
  0x75   : > { %456 = vmatpush.msra.mxu0 %v403_v11  ;;  %1723 = vmatpush.msra.mxu2 %v403_v11 }
  0x76   : > { %v1312_v14 = vadd.f32 %v1311_v12, %v2487_v44  ;;  %457 = vmatmul.f32.vlgmr.msra.gmra.mxu0 %v2402_v16  ;;  %508 = vmatmul.f32.vlgmr.msra.gmra.mxu2 %v2405_v17 }
  0x78   : > { %v1313_v26 = vadd.f32 %v1312_v14, %v2500_v49 }
  0x7a   : > { %582 = vmatmul.f32.gmra.mxu1 %v2434_v24  ;;  %633 = vmatmul.f32.gmra.mxu3 %v2437_v25  ;;  %v1314_v30 = vadd.f32 %v1313_v26, %v2513_v54 }
  0x7c   : > { %v1315_v34 = vadd.f32 %v1314_v30, %v2526_v59 }
  0x7e   : > { %v1316_v38 = vadd.f32 %v1315_v34, %v2539_v1  ;;  %460 = vmatmul.f32.gmra.mxu0 %v2410_v18  ;;  %511 = vmatmul.f32.gmra.mxu2 %v2413_v19 }
  0x80   : > { %v1317_v46 = vadd.f32 %v1316_v38, %v2548_v6 }
  0x82   : > { %585 = vmatmul.f32.gmra.mxu1 %v2444_v27  ;;  %636 = vmatmul.f32.gmra.mxu3 %v2447_v28  ;;  %v1318_v51 = vrot.slane %v1317_v46, 4 }
  0x84   : > { %v1319_v56 = vadd.f32 %v1318_v51, %v1317_v46 }
  0x86   : > { %v1320_v63 = vrot.slane %v1319_v56, 2  ;;  %463 = vmatmul.f32.gmra.mxu0 %v2418_v20  ;;  %514 = vmatmul.f32.gmra.mxu2 %v2421_v21 }
  0x88   : > { %v1321_v3 = vadd.f32 %v1320_v63, %v1319_v56 }
  0x8a   : > { %588 = vmatmul.f32.gmra.mxu1 %v2454_v31  ;;  %639 = vmatmul.f32.gmra.mxu3 %v2457_v32  ;;  %v1322_v5 = vrot.slane %v1321_v3, 1 }
  0x8c   : > { %v1323_v9 = vadd.f32 %v1322_v5, %v1321_v3 }
  0x8e   : > { %v1324_v12 = vadd.f32 %v1323_v9, %v1286_v7  ;;  %466 = vmatmul.f32.gmra.mxu0 %v2426_v22  ;;  %517 = vmatmul.f32.gmra.mxu2 %v2429_v23 }
  0x90   : > { %1325 = vst [vmem:[#allocation5] sm:$0x1] %v1324_v12 }
  0x92   : > { %591 = vmatmul.f32.gmra.mxu1 %v2464_v35  ;;  %642 = vmatmul.f32.gmra.mxu3 %v2467_v36 }
  0x96   : > { %469 = vmatmul.f32.gmra.mxu0 %v2434_v24  ;;  %520 = vmatmul.f32.gmra.mxu2 %v2437_v25 }
  0x9a   : > { %594 = vmatmul.f32.gmra.mxu1 %v2474_v39  ;;  %645 = vmatmul.f32.gmra.mxu3 %v2477_v40 }
  0x9e   : > { %472 = vmatmul.f32.gmra.mxu0 %v2444_v27  ;;  %523 = vmatmul.f32.gmra.mxu2 %v2447_v28 }
  0xa2   : > { %597 = vmatmul.f32.gmra.mxu1 %v2483_v42  ;;  %648 = vmatmul.f32.gmra.mxu3 %v2487_v44 }
  0xa6   : > { %475 = vmatmul.f32.gmra.mxu0 %v2454_v31  ;;  %526 = vmatmul.f32.gmra.mxu2 %v2457_v32 }
  0xaa   : > { %600 = vmatmul.f32.gmra.mxu1 %v2490_v45  ;;  %651 = vmatmul.f32.gmra.mxu3 %v2500_v49 }
  0xae   : > { %478 = vmatmul.f32.gmra.mxu0 %v2464_v35  ;;  %529 = vmatmul.f32.gmra.mxu2 %v2467_v36 }
  0xb2   : > { %603 = vmatmul.f32.gmra.mxu1 %v2496_v47  ;;  %654 = vmatmul.f32.gmra.mxu3 %v2513_v54 }
  0xb6   : > { %481 = vmatmul.f32.gmra.mxu0 %v2474_v39  ;;  %532 = vmatmul.f32.gmra.mxu2 %v2477_v40 }
  0xba   : > { %606 = vmatmul.f32.gmra.mxu1 %v2503_v50  ;;  %657 = vmatmul.f32.gmra.mxu3 %v2526_v59 }
  0xbe   : > { %484 = vmatmul.f32.gmra.mxu0 %v2483_v42  ;;  %535 = vmatmul.f32.gmra.mxu2 %v2487_v44 }
  0xc2   : > { %609 = vmatmul.f32.gmra.mxu1 %v2509_v52  ;;  %660 = vmatmul.f32.gmra.mxu3 %v2539_v1 }
  0xc6   : > { %487 = vmatmul.f32.gmra.mxu0 %v2490_v45  ;;  %538 = vmatmul.f32.gmra.mxu2 %v2500_v49 }
  0xca   : > { %612 = vmatmul.f32.gmra.mxu1 %v2516_v55  ;;  %663 = vmatmul.f32.gmra.mxu3 %v2548_v6 }
  0xce   : > { %490 = vmatmul.f32.gmra.mxu0 %v2496_v47  ;;  %541 = vmatmul.f32.gmra.mxu2 %v2513_v54 }
  0xd2   : > { %615 = vmatmul.f32.gmra.mxu1 %v2522_v57 }
  0xd6   : > { %493 = vmatmul.f32.gmra.mxu0 %v2503_v50  ;;  %544 = vmatmul.f32.gmra.mxu2 %v2526_v59 }
  0xd7   : > { %v571_v41 = vpop.f32.mrf.mxu1 }
  0xd8   : > { %v2577_v33 = vadd.f32 %v571_v41, %v2574_v29 }
  0xda   : > { %618 = vmatmul.f32.gmra.mxu1 %v2529_v60  ;;  %v2586_v17 = vsel %vm799_vm0, %v2577_v33, -inf }
  0xdd   : > { %v2563_v58 = vpop.f32.mrf.mxu3 }
  0xde   : > { %v2658_v11 = vadd.f32 %v2563_v58, %v2574_v29  ;;  %496 = vmatmul.f32.gmra.mxu0 %v2509_v52  ;;  %547 = vmatmul.f32.gmra.mxu2 %v2539_v1 }
  0xdf   : > { %v574_v0 = vpop.f32.mrf.mxu1 }
  0xe0   : > { %v2595_v38 = vadd.f32 %v574_v0, %v2574_v29  ;;  %v830_v32 = vsel %vm799_vm0, %v2658_v11, -inf }
  0xe2   : > { %v2604_v21 = vsel %vm799_vm0, %v2595_v38, -inf }
  0xe5   : > { %v2565_v10 = vpop.f32.mrf.mxu3 }
  0xe6   : > { %v2662_v31 = vadd.f32 %v2565_v10, %v2574_v29  ;;  %499 = vmatmul.f32.gmra.mxu0 %v2516_v55  ;;  %550 = vmatmul.f32.gmra.mxu2 %v2548_v6  ;;  %v1465_v55 = vld [vmem:[#allocation12 + $0x78] sm:$0xff] }
  0xe7   : > { %v577_v13 = vpop.f32.mrf.mxu1  ;;  %1467 = vmatpush.msrb.mxu3 %v1465_v55 }
  0xe8   : > { %v2613_v51 = vadd.f32 %v577_v13, %v2574_v29  ;;  %v832_v35 = vsel %vm799_vm0, %v2662_v31, -inf }
  0xe9   : > { %v831_v58 = vmax.f32 %v832_v35, %v830_v32 }
  0xea   : > { %v2622_v23 = vsel %vm799_vm0, %v2613_v51, -inf }
  0xed   : > { %v628_v14 = vpop.f32.mrf.mxu3 }
  0xee   : > { %v2669_v36 = vadd.f32 %v628_v14, %v2574_v29  ;;  %502 = vmatmul.f32.gmra.mxu0 %v2522_v57  ;;  %v1462_v57 = vld [vmem:[#allocation12 + $0x60] sm:$0xff] }
  0xef   : > { %v580_v26 = vpop.f32.mrf.mxu1 }
  0xf0   : > { %v2631_v0 = vadd.f32 %v580_v26, %v2574_v29  ;;  %v834_v10 = vsel %vm799_vm0, %v2669_v36, -inf }
  0xf2   : > { %v2640_v25 = vsel %vm799_vm0, %v2631_v0, -inf }
  0xf5   : > { %v631_v30 = vpop.f32.mrf.mxu3 }
  0xf6   : > { %v2672_v40 = vadd.f32 %v631_v30, %v2574_v29  ;;  %505 = vmatmul.f32.gmra.mxu0 %v2529_v60  ;;  %v1461_v60 = vld [vmem:[#allocation12 + $0x58] sm:$0xff] }
  0xf7   : > { %v583_v34 = vpop.f32.mrf.mxu1 }
  0xf8   : > { %v2580_v16 = vadd.f32 %v583_v34, %v2574_v29  ;;  %v836_v14 = vsel %vm799_vm0, %v2672_v40, -inf  ;;  %v833_v34 = vmax.f32 %v834_v10, %v831_v58 }
  0xfa   : > { %v2590_v18 = vsel %vm799_vm0, %v2580_v16, -inf  ;;  %v839_v44 = vmax.f32 %v836_v14, %v833_v34 }
  0xfb   : > { %v805_v19 = vmax.f32 %v2586_v17, %v2590_v18 }
  0xfd   : > { %v634_v37 = vpop.f32.mrf.mxu3 }
  0xfe   : > { %v2679_v13 = vadd.f32 %v634_v37, %v2574_v29 }
  0xff   : > { %v586_v41 = vpop.f32.mrf.mxu1 }
 0x100   : > { %v2598_v20 = vadd.f32 %v586_v41, %v2574_v29  ;;  %v838_v30 = vsel %vm799_vm0, %v2679_v13, -inf }
 0x102   : > { %v2608_v43 = vsel %vm799_vm0, %v2598_v20, -inf }
 0x103   : > { %v807_v46 = vmax.f32 %v2604_v21, %v2608_v43 }
 0x105   : > { %v637_v48 = vpop.f32.mrf.mxu3 }
 0x106   : > { %v2684_v26 = vadd.f32 %v637_v48, %v2574_v29  ;;  %v847_v48 = vmax.f32 %v839_v44, %v838_v30 }
 0x107   : > { %v589_v53 = vpop.f32.mrf.mxu1 }
 0x108   : > { %v2616_v22 = vadd.f32 %v589_v53, %v2574_v29  ;;  %v840_v37 = vsel %vm799_vm0, %v2684_v26, -inf }
 0x109   : > { %v855_v58 = vmax.f32 %v847_v48, %v840_v37 }
 0x10a   : > { %v2626_v56 = vsel %vm799_vm0, %v2616_v22, -inf }
 0x10b   : > { %v809_v61 = vmax.f32 %v2622_v23, %v2626_v56 }
 0x10d   : > { %v640_v63 = vpop.f32.mrf.mxu3 }
 0x10e   : > { %v2689_v42 = vadd.f32 %v640_v63, %v2574_v29 }
 0x10f   : > { %v592_v2 = vpop.f32.mrf.mxu1 }
 0x110   : > { %v2634_v24 = vadd.f32 %v592_v2, %v2574_v29  ;;  %v842_v32 = vsel %vm799_vm0, %v2689_v42, -inf }
 0x111   : > { %v835_v45 = vmax.f32 %v842_v32, %v855_v58 }
 0x112   : > { %v2644_v3 = vsel %vm799_vm0, %v2634_v24, -inf }
 0x113   : > { %v811_v4 = vmax.f32 %v2640_v25, %v2644_v3 }
 0x115   : > { %v643_v5 = vpop.f32.mrf.mxu3 }
 0x116   : > { %v2694_v2 = vadd.f32 %v643_v5, %v2574_v29 }
 0x117   : > { %v2648_v7 = vpop.f32.mrf.mxu1 }
 0x118   : > { %v844_v10 = vsel %vm799_vm0, %v2694_v2, -inf  ;;  %v2765_v23 = vadd.f32 %v2648_v7, %v2574_v29 }
 0x119   : > { %v841_v34 = vmax.f32 %v844_v10, %v835_v45 }
 0x11d   : > { %v646_v27 = vpop.f32.mrf.mxu3 }
 0x11e   : > { %v2704_v35 = vadd.f32 %v646_v27, %v2574_v29  ;;  %v2222_v27 = vmov -1e+30  }
 0x11f   : > { %v598_v28 = vpop.f32.mrf.mxu1  ;;  %367 = vst.msk [vmem:[#allocation2] sm:$0x1] %vm366_vm1, %v2222_v27 }
 0x120   : > { %v2701_v63 = vadd.f32 %v598_v28, %v2574_v29  ;;  %v846_v14 = vsel %vm799_vm0, %v2704_v35, -inf }
 0x121   : > { %v849_v37 = vmax.f32 %v841_v34, %v846_v14 }
 0x122   : > { %v814_v49 = vsel %vm799_vm0, %v2701_v63, -inf }
 0x125   : > { %v649_v8 = vpop.f32.mrf.mxu3 }
 0x126   : > { %v2709_v5 = vadd.f32 %v649_v8, %v2574_v29 }
 0x127   : > { %v601_v9 = vpop.f32.mrf.mxu1 }
 0x128   : > { %v848_v8 = vsel %vm799_vm0, %v2709_v5, -inf  ;;  %v2732_v32 = vadd.f32 %v601_v9, %v2574_v29 }
 0x129   : > { %v857_v10 = vmax.f32 %v849_v37, %v848_v8 }
 0x12a   : > { %v816_v21 = vsel %vm799_vm0, %v2732_v32, -inf }
 0x12d   : > { %v652_v12 = vpop.f32.mrf.mxu3 }
 0x12e   : > { %v2716_v28 = vadd.f32 %v652_v12, %v2574_v29  ;;  %v815_v12 = vmax.f32 %v807_v46, %v814_v49 }
 0x12f   : > { %v604_v39 = vpop.f32.mrf.mxu1 }
 0x130   : > { %v850_v62 = vsel %vm799_vm0, %v2716_v28, -inf  ;;  %v2754_v14 = vadd.f32 %v604_v39, %v2574_v29 }
 0x131   : > { %v837_v54 = vmax.f32 %v850_v62, %v857_v10  ;;  %v812_v10 = vsel %vm799_vm0, %v2765_v23, -inf }
 0x132   : > { %v818_v50 = vsel %vm799_vm0, %v2754_v14, -inf  ;;  %v813_v3 = vmax.f32 %v805_v19, %v812_v10 }
 0x133   : > { %v819_v39 = vmax.f32 %v811_v4, %v818_v50 }
 0x135   : > { %v655_v53 = vpop.f32.mrf.mxu3 }
 0x136   : > { %v2739_v47 = vadd.f32 %v655_v53, %v2574_v29  ;;  %v817_v53 = vmax.f32 %v809_v61, %v816_v21 }
 0x137   : > { %v607_v41 = vpop.f32.mrf.mxu1 }
 0x138   : > { %v852_v9 = vsel %vm799_vm0, %v2739_v47, -inf }
 0x13d   : > { %v658_v48 = vpop.f32.mrf.mxu3 }
 0x13f   : > { %v610_v30 = vpop.f32.mrf.mxu1 }
 0x140   : > { %v2724_v44 = vadd.f32 %v610_v30, %v2574_v29 }
 0x142   : > { %v822_v58 = vsel %vm799_vm0, %v2724_v44, -inf }
 0x143   : > { %v823_v45 = vmax.f32 %v815_v12, %v822_v58  ;;  %v2759_v12 = vadd.f32 %v658_v48, %v2574_v29  ;;  %v2778_v48 = vadd.f32 %v607_v41, %v2574_v29 }
 0x145   : > { %v845_v43 = vmax.f32 %v837_v54, %v823_v45  ;;  %v661_v8 = vpop.f32.mrf.mxu3  ;;  %v854_v56 = vsel %vm799_vm0, %v2759_v12, -inf  ;;  %v820_v25 = vsel %vm799_vm0, %v2778_v48, -inf }
 0x146   : > { %v2785_v45 = vadd.f32 %v661_v8, %v2574_v29  ;;  %v2808_v8 = vld [vmem:[#allocation2] sm:$0x1] }
 0x147   : > { %v613_v46 = vpop.f32.mrf.mxu1  ;;  %v853_v34 = vmax.f32 %v845_v43, %v852_v9  ;;  %v821_v43 = vmax.f32 %v813_v3, %v820_v25 }
 0x148   : > { %v2746_v49 = vadd.f32 %v613_v46, %v2574_v29  ;;  %v856_v41 = vsel %vm799_vm0, %v2785_v45, -inf }
 0x14a   : > { %v824_v27 = vsel %vm799_vm0, %v2746_v49, -inf }
 0x14b   : > { %v825_v30 = vmax.f32 %v817_v53, %v824_v27 }
 0x14d   : > { %v843_v37 = vmax.f32 %v825_v30, %v853_v34  ;;  %v664_v1 = vpop.f32.mrf.mxu3 }
 0x14e   : > { %v2798_v21 = vadd.f32 %v664_v1, %v2574_v29 }
 0x14f   : > { %v616_v59 = vpop.f32.mrf.mxu1  ;;  %v851_v62 = vmax.f32 %v843_v37, %v854_v56  ;;  %v1464_v37 = vld [vmem:[#allocation12 + $0x70] sm:$0xff] }
 0x150   : > { %v2770_v61 = vadd.f32 %v616_v59, %v2574_v29  ;;  %v858_v19 = vsel %vm799_vm0, %v2798_v21, -inf  ;;  %1468 = vmatpush.msrb.mxu3 %v1464_v37  ;;  %v1463_v59 = vld [vmem:[#allocation12 + $0x68] sm:$0xff] }
 0x152   : > { %v826_v7 = vsel %vm799_vm0, %v2770_v61, -inf  ;;  %1469 = vmatpush.msrb.mxu3 %v1463_v59 }
 0x153   : > { %v827_v58 = vmax.f32 %v819_v39, %v826_v7 }
 0x154   : > { %1470 = vmatpush.msrb.mxu3 %v1462_v57 }
 0x155   : > { %v859_v52 = vmax.f32 %v851_v62, %v827_v58 }
 0x156   : > { %1471 = vmatpush.msrb.mxu3 %v1461_v60  ;;  %v1456_v60 = vld [vmem:[#allocation12 + $0x30] sm:$0xff] }
 0x157   : > { %v619_v4 = vpop.f32.mrf.mxu1  ;;  %v860_v17 = vmax.f32 %v856_v41, %v859_v52  ;;  %v1457_v41 = vld [vmem:[#allocation12 + $0x38] sm:$0xff] }
 0x158   : > { %v2795_v54 = vadd.f32 %v619_v4, %v2574_v29  ;;  %v1459_v4 = vld [vmem:[#allocation12 + $0x48] sm:$0xff] }
 0x15a   : > { %v828_v46 = vsel %vm799_vm0, %v2795_v54, -inf }
 0x15b   : > { %v829_v18 = vmax.f32 %v821_v43, %v828_v46 }
 0x15d   : > { %v861_v9 = vmax.f32 %v829_v18, %v860_v17 }
 0x15f   : > { %v862_v53 = vmax.f32 %v858_v19, %v861_v9 }
 0x161   : > { %v863_v27 = vrot.slane %v862_v53, 4 }
 0x163   : > { %v864_v29 = vmax.f32 %v862_v53, %v863_v27 }
 0x165   : > { %v865_v34 = vrot.slane %v864_v29, 2 }
 0x167   : > { %v866_v30 = vmax.f32 %v864_v29, %v865_v34 }
 0x169   : > { %v867_v6 = vrot.slane %v866_v30, 1 }
 0x16b   : > { %v868_v50 = vmax.f32 %v866_v30, %v867_v6 }
 0x16d   : > { %v2811_v56 = vmax.f32 %v2808_v8, %v868_v50 }
 0x16f   : > { %v870_v39 = vsub.f32 %v2808_v8, %v2811_v56  ;;  %v2816_v7 = vperm.slane %v2811_v56, 0  ;;  %1285 = vst.msk [vmem:[#allocation2] sm:$0x1] %vm366_vm1, %v2811_v56  ;;  %v972_v8 = vld [vmem:[#allocation3] sm:$0x1] }
 0x171   : > { %v876_v62 = vsub.f32 %v2577_v33, %v2816_v7  ;;  %v877_v58 = vsub.f32 %v2595_v38, %v2816_v7  ;;  %v878_v10 = vsub.f32 %v2613_v51, %v2816_v7  ;;  %v879_v52 = vsub.f32 %v2631_v0, %v2816_v7  ;;  %v1460_v33 = vld [vmem:[#allocation12 + $0x50] sm:$0xff] }
 0x172   : > { %v880_v1 = vsub.f32 %v2580_v16, %v2816_v7  ;;  %v881_v25 = vsub.f32 %v2598_v20, %v2816_v7  ;;  %v882_v3 = vsub.f32 %v2616_v22, %v2816_v7  ;;  %v883_v38 = vsub.f32 %v2634_v24, %v2816_v7  ;;  %1472 = vmatpush.msrb.mxu3 %v1460_v33  ;;  %v1458_v20 = vld [vmem:[#allocation12 + $0x40] sm:$0xff] }
 0x173   : > { %v889_v51 = vsub.f32 %v2724_v44, %v2816_v7  ;;  %v890_v0 = vsub.f32 %v2746_v49, %v2816_v7  ;;  %v891_v16 = vsub.f32 %v2770_v61, %v2816_v7  ;;  %v904_v22 = vsub.f32 %v2739_v47, %v2816_v7 }
 0x174   : > { %1473 = vmatpush.msrb.mxu3 %v1459_v4  ;;  %v905_v24 = vsub.f32 %v2759_v12, %v2816_v7  ;;  %v906_v43 = vsub.f32 %v2785_v45, %v2816_v7  ;;  %v907_v46 = vsub.f32 %v2798_v21, %v2816_v7  ;;  %v908_v17 = vmul.f32 1.442695, %v876_v62 }
 0x175   : > { %v910_v18 = vmul.f32 1.442695, %v877_v58  ;;  %v912_v19 = vmul.f32 1.442695, %v878_v10  ;;  %v914_v9 = vmul.f32 1.442695, %v879_v52  ;;  %v884_v34 = vsub.f32 %v2765_v23, %v2816_v7 }
 0x176   : > { %1474 = vmatpush.msrb.mxu3 %v1458_v20  ;;  %1859 = vpow2.f32 %v908_v17  ;;  %v916_v53 = vmul.f32 1.442695, %v880_v1  ;;  %v918_v27 = vmul.f32 1.442695, %v881_v25  ;;  %v920_v30 = vmul.f32 1.442695, %v882_v3 }
 0x177   : > { %1861 = vpow2.f32 %v910_v18  ;;  %v885_v37 = vsub.f32 %v2701_v63, %v2816_v7  ;;  %v922_v50 = vmul.f32 1.442695, %v883_v38  ;;  %v886_v23 = vsub.f32 %v2732_v32, %v2816_v7  ;;  %v1455_v52 = vld [vmem:[#allocation12 + $0x28] sm:$0xff]  ;;  %v1454_v25 = vld [vmem:[#allocation12 + $0x20] sm:$0xff]  ;;  %v1453_v20 = vld [vmem:[#allocation12 + $0x18] sm:$0xff] }
 0x178   : > { %1475 = vmatpush.msrb.mxu3 %v1457_v41  ;;  %1863 = vpow2.f32 %v912_v19  ;;  %v924_v58 = vmul.f32 1.442695, %v884_v34  ;;  %v887_v3 = vsub.f32 %v2754_v14, %v2816_v7  ;;  %v2223_v4 = vmov 0   ;;  %v2870_v14 = vpop.f32.mrf.mxu0 }
 0x179   : > { %1865 = vpow2.f32 %v914_v9  ;;  %v926_v33 = vmul.f32 1.442695, %v885_v37  ;;  %1858 = vset.pattern.permute.xlu2 %v2223_v4  ;;  %1857 = vset.pattern.permute.xlu1 %v2223_v4  ;;  %v888_v17 = vsub.f32 %v2778_v48, %v2816_v7  ;;  %v928_v18 = vmul.f32 1.442695, %v886_v23  ;;  %v1448_v37 = vld [vmem:[#allocation5] sm:$0x1] }
 0x17a   : > { %1867 = vpow2.f32 %v916_v53  ;;  %1476 = vmatpush.msrb.mxu3 %v1456_v60  ;;  %1856 = vset.pattern.permute.xlu0 %v2223_v4  ;;  %v1452_v53 = vld [vmem:[#allocation12 + $0x10] sm:$0xff]  ;;  %v930_v34 = vmul.f32 1.442695, %v887_v3  ;;  %v1449_v23 = vmul.f32 0.00390625, %v1448_v37  ;;  %v936_v3 = vmul.f32 1.442695, %v890_v0 }
 0x17b   : > { %1869 = vpow2.f32 %v918_v27  ;;  %v893_v4 = vsub.f32 %v2658_v11, %v2816_v7  ;;  %v938_v49 = vmul.f32 1.442695, %v891_v16  ;;  %v895_v61 = vsub.f32 %v2669_v36, %v2816_v7 }
 0x17c   : > { %v1860_v29 = vpop.eup %1859  ;;  %1871 = vpow2.f32 %v920_v30  ;;  %1477 = vmatpush.msrb.mxu3 %v1455_v52  ;;  %v897_v37 = vsub.f32 %v2679_v13, %v2816_v7  ;;  %v899_v13 = vsub.f32 %v2689_v42, %v2816_v7  ;;  %v970_v12 = vmul.f32 1.442695, %v907_v46 }
 0x17d   : > { %v2852_v55 = vpop.eup %1861  ;;  %v974_v59 = vsel %vm799_vm0, %v1860_v29, 0.0  ;;  %1873 = vpow2.f32 %v922_v50  ;;  %1056 = vperm.xlu0 %1856, %v1860_v29   ;;  %v1451_v50 = vld [vmem:[#allocation12 + $0x8] sm:$0xff]  ;;  %v1450_v29 = vld [vmem:[#allocation12] sm:$0xff]  ;;  %v942_v16 = vmul.f32 1.442695, %v893_v4 }
 0x17e   : > { %v1864_v6 = vpop.eup %1863  ;;  %v975_v57 = vsel %vm799_vm0, %v2852_v55, 0.0  ;;  %1875 = vpow2.f32 %v924_v58  ;;  %1478 = vmatpush.msrb.mxu3 %v1454_v25  ;;  %v892_v25 = vsub.f32 %v2795_v54, %v2816_v7  ;;  %v954_v4 = vmul.f32 1.442695, %v899_v13 }
 0x17f   : > { %v2859_v62 = vpop.eup %1865  ;;  %v976_v10 = vadd.f32 %v975_v57, %v974_v59  ;;  %v977_v63 = vsel %vm799_vm0, %v1864_v6, 0.0  ;;  %1066 = vperm.xlu1 %1857, %v1864_v6   ;;  %1877 = vpow2.f32 %v926_v33  ;;  %v932_v57 = vmul.f32 1.442695, %v888_v17 }
 0x180   : > { %v1868_v1 = vpop.eup %1867  ;;  %v979_v32 = vsel %vm799_vm0, %v2859_v62, 0.0  ;;  %1479 = vmatpush.msrb.mxu3 %v1453_v20  ;;  %1879 = vpow2.f32 %v928_v18  ;;  %v894_v20 = vsub.f32 %v2662_v31, %v2816_v7 }
 0x181   : > { %v978_v38 = vadd.f32 %v977_v63, %v976_v10  ;;  %v1870_v41 = vpop.eup %1869  ;;  %1076 = vperm.xlu2 %1858, %v1868_v1   ;;  %v981_v9 = vsel %vm799_vm0, %v1868_v1, 0.0  ;;  %1881 = vpow2.f32 %v930_v34  ;;  %v934_v10 = vmul.f32 1.442695, %v889_v51 }
 0x182   : > { %v2873_v27 = vpop.eup %1871  ;;  %v983_v48 = vsel %vm799_vm0, %v1870_v41, 0.0  ;;  %1480 = vmatpush.msrb.mxu3 %v1452_v53  ;;  %1883 = vpow2.f32 %v932_v57  ;;  %v944_v31 = vmul.f32 1.442695, %v894_v20 }
 0x183   : > { %v980_v19 = vadd.f32 %v979_v32, %v978_v38  ;;  %v1874_v59 = vpop.eup %1873  ;;  %v985_v6 = vsel %vm799_vm0, %v2873_v27, 0.0  ;;  %v2889_v38 = vpop.f32.mrf.mxu0  ;;  %1885 = vpow2.f32 %v934_v10 }
 0x184   : > { %v1876_v58 = vpop.eup %1875  ;;  %1481 = vmatpush.msrb.mxu3 %v1451_v50  ;;  %v987_v1 = vsel %vm799_vm0, %v1874_v59, 0.0  ;;  %1887 = vpow2.f32 %v936_v3 }
 0x185   : > { %v982_v30 = vadd.f32 %v981_v9, %v980_v19  ;;  %v2882_v63 = vpop.eup %1877  ;;  %v989_v44 = vsel %vm799_vm0, %v1876_v58, 0.0  ;;  %1061 = vperm.xlu0 %1856, %v2852_v55   ;;  %1889 = vpow2.f32 %v938_v49  ;;  %v896_v9 = vsub.f32 %v2672_v40, %v2816_v7 }
 0x186   : > { %1482 = vmatpush.msrb.mxu3 %v1450_v29  ;;  %v1880_v51 = vpop.eup %1879  ;;  %v991_v0 = vsel %vm799_vm0, %v2882_v63, 0.0 }
 0x187   : > { %v984_v60 = vadd.f32 %v983_v48, %v982_v30  ;;  %1483 = vmatmul.f32.vlgmr.msrb.gmra.mxu3 %v1449_v23  ;;  %1071 = vperm.xlu1 %1857, %v2859_v62   ;;  %v1882_v32 = vpop.eup %1881  ;;  %v940_v62 = vmul.f32 1.442695, %v892_v25  ;;  %v993_v11 = vsel %vm799_vm0, %v1880_v51, 0.0  ;;  %v946_v48 = vmul.f32 1.442695, %v895_v61 }
 0x188   : > { %v2904_v17 = vpop.eup %1883  ;;  %v995_v18 = vsel %vm799_vm0, %v1882_v32, 0.0 }
 0x189   : > { %v986_v52 = vadd.f32 %v985_v6, %v984_v60  ;;  %1081 = vperm.xlu2 %1858, %v1870_v41   ;;  %v1886_v19 = vpop.eup %1885  ;;  %1891 = vpow2.f32 %v940_v62  ;;  %v997_v30 = vsel %vm799_vm0, %v2904_v17, 0.0  ;;  %v898_v60 = vsub.f32 %v2684_v26, %v2816_v7 }
 0x18a   : > { %v1888_v36 = vpop.eup %1887  ;;  %1893 = vpow2.f32 %v942_v16  ;;  %v999_v40 = vsel %vm799_vm0, %v1886_v19, 0.0  ;;  %v948_v6 = vmul.f32 1.442695, %v896_v9  ;;  %v900_v26 = vsub.f32 %v2694_v2, %v2816_v7 }
 0x18b   : > { %v988_v33 = vadd.f32 %v987_v1, %v986_v52  ;;  %v2911_v34 = vpop.f32.mrf.mxu0  ;;  %v2919_v57 = vpop.eup %1889  ;;  %1895 = vpow2.f32 %v944_v31  ;;  %v952_v1 = vmul.f32 1.442695, %v898_v60 }
 0x18c   : > { %1897 = vpow2.f32 %v946_v48  ;;  %v1003_v10 = vsel %vm799_vm0, %v2919_v57, 0.0 }
 0x18d   : > { %v990_v54 = vadd.f32 %v989_v44, %v988_v33  ;;  %1086 = vperm.xlu0 %1856, %v2873_v27   ;;  %1899 = vpow2.f32 %v948_v6  ;;  %v901_v44 = vsub.f32 %v2704_v35, %v2816_v7  ;;  %v903_v35 = vsub.f32 %v2716_v28, %v2816_v7 }
 0x18e   : > { %v968_v6 = vmul.f32 1.442695, %v906_v43 }
 0x18f   : > { %v992_v41 = vadd.f32 %v991_v0, %v990_v54  ;;  %1091 = vperm.xlu1 %1857, %v1874_v59   ;;  %v1001_v59 = vsel %vm799_vm0, %v1888_v36, 0.0  ;;  %v2924_v23 = vpop.eup %1891  ;;  %v902_v0 = vsub.f32 %v2709_v5, %v2816_v7  ;;  %v962_v9 = vmul.f32 1.442695, %v903_v35 }
 0x190   : > { %v1894_v52 = vpop.eup %1893  ;;  %v1005_v33 = vsel %vm799_vm0, %v2924_v23, 0.0 }
 0x191   : > { %v994_v55 = vadd.f32 %v993_v11, %v992_v41  ;;  %1096 = vperm.xlu2 %1858, %v1876_v58   ;;  %v950_v58 = vmul.f32 1.442695, %v897_v37  ;;  %v2936_v42 = vpop.eup %1895  ;;  %v1007_v2 = vsel %vm799_vm0, %v1894_v52, 0.0  ;;  %v958_v41 = vmul.f32 1.442695, %v901_v44  ;;  %v2983_v44 = vpop.f32.mrf.mxu2 }
 0x192   : > { %v1898_v54 = vpop.eup %1897  ;;  %v960_v16 = vmul.f32 1.442695, %v902_v0 }
 0x193   : > { %v996_v53 = vadd.f32 %v995_v18, %v994_v55  ;;  %v2932_v3 = vpop.f32.mrf.mxu0  ;;  %1901 = vpow2.f32 %v950_v58  ;;  %v1900_v62 = vpop.eup %1899 }
 0x194   : > { %1903 = vpow2.f32 %v952_v1  ;;  %v1013_v55 = vsel %vm799_vm0, %v1900_v62, 0.0 }
 0x195   : > { %v998_v50 = vadd.f32 %v997_v30, %v996_v53  ;;  %1101 = vperm.xlu0 %1856, %v2882_v63   ;;  %1905 = vpow2.f32 %v954_v4  ;;  %v1011_v63 = vsel %vm799_vm0, %v1898_v54, 0.0 }
 0x197   : > { %v1000_v29 = vadd.f32 %v999_v40, %v998_v50  ;;  %1106 = vperm.xlu1 %1857, %v1880_v51   ;;  %v1009_v51 = vsel %vm799_vm0, %v2936_v42, 0.0 }
 0x199   : > { %v1002_v27 = vadd.f32 %v1001_v59, %v1000_v29  ;;  %1111 = vperm.xlu2 %1858, %v1882_v32   ;;  %v956_v32 = vmul.f32 1.442695, %v900_v26  ;;  %v2949_v61 = vpop.eup %1901 }
 0x19a   : > { %v1904_v18 = vpop.eup %1903  ;;  %v1015_v53 = vsel %vm799_vm0, %v2949_v61, 0.0 }
 0x19b   : > { %v1004_v25 = vadd.f32 %v1003_v10, %v1002_v27  ;;  %1907 = vpow2.f32 %v956_v32  ;;  %v2953_v28 = vpop.f32.mrf.mxu0  ;;  %v1906_v30 = vpop.eup %1905 }
 0x19c   : > { %1909 = vpow2.f32 %v958_v41  ;;  %v1019_v40 = vsel %vm799_vm0, %v1906_v30, 0.0 }
 0x19d   : > { %v1006_v49 = vadd.f32 %v1005_v33, %v1004_v25  ;;  %1116 = vperm.xlu0 %1856, %v2904_v17   ;;  %1911 = vpow2.f32 %v960_v16  ;;  %v966_v17 = vmul.f32 1.442695, %v905_v24 }
 0x19e   : > { %1913 = vpow2.f32 %v962_v9 }
 0x19f   : > { %v1008_v20 = vadd.f32 %v1007_v2, %v1006_v49  ;;  %1121 = vperm.xlu1 %1857, %v1886_v19   ;;  %v1017_v19 = vsel %vm799_vm0, %v1904_v18, 0.0  ;;  %v871_v2 = vmul.f32 1.442695, %v870_v39  ;;  %v1369_v39 = vld [vmem:[#allocation11 + $0x78] sm:$0xff] }
 0x1a0   : > { %1371 = vmatpush.msrb.mxu2 %v1369_v39 }
 0x1a1   : > { %v1010_v11 = vadd.f32 %v1009_v51, %v1008_v20  ;;  %1126 = vperm.xlu2 %1858, %v1888_v36   ;;  %v964_v36 = vmul.f32 1.442695, %v904_v22  ;;  %v1908_v48 = vpop.eup %1907  ;;  %v2992_v51 = vpop.f32.mrf.mxu2 }
 0x1a2   : > { %v1910_v60 = vpop.eup %1909  ;;  %v1021_v22 = vsel %vm799_vm0, %v1908_v48, 0.0 }
 0x1a3   : > { %v1012_v5 = vadd.f32 %v1011_v63, %v1010_v11  ;;  %1915 = vpow2.f32 %v964_v36  ;;  %v1912_v29 = vpop.eup %1911  ;;  %v1023_v59 = vsel %vm799_vm0, %v1910_v60, 0.0  ;;  %v2975_v43 = vpop.f32.mrf.mxu0 }
 0x1a4   : > { %1917 = vpow2.f32 %v966_v17  ;;  %v1914_v13 = vpop.eup %1913  ;;  %v1025_v58 = vsel %vm799_vm0, %v1912_v29, 0.0 }
 0x1a5   : > { %v1014_v31 = vadd.f32 %v1013_v55, %v1012_v5  ;;  %1131 = vperm.xlu0 %1856, %v2919_v57   ;;  %1919 = vpow2.f32 %v968_v6  ;;  %v1027_v10 = vsel %vm799_vm0, %v1914_v13, 0.0  ;;  %v1368_v55 = vld [vmem:[#allocation11 + $0x70] sm:$0xff] }
 0x1a6   : > { %1921 = vpow2.f32 %v970_v12  ;;  %1372 = vmatpush.msrb.mxu2 %v1368_v55  ;;  %v1466_v55 = vld [vmem:[#allocation14 + $0x5] sm:$0x1] }
 0x1a7   : > { %v1016_v37 = vadd.f32 %v1015_v53, %v1014_v31  ;;  %1136 = vperm.xlu1 %1857, %v2924_v23   ;;  %1923 = vpow2.f32 %v871_v2  ;;  %v1367_v53 = vld [vmem:[#allocation11 + $0x68] sm:$0xff] }
 0x1a8   : > { %1373 = vmatpush.msrb.mxu2 %v1367_v53 }
 0x1a9   : > { %v1018_v50 = vadd.f32 %v1017_v19, %v1016_v37  ;;  %1141 = vperm.xlu2 %1858, %v1894_v52   ;;  %v1916_v27 = vpop.eup %1915  ;;  %v1366_v19 = vld [vmem:[#allocation11 + $0x60] sm:$0xff] }
 0x1aa   : > { %v1918_v52 = vpop.eup %1917  ;;  %v1029_v7 = vsel %vm799_vm0, %v1916_v27, 0.0  ;;  %1374 = vmatpush.msrb.mxu2 %v1366_v19 }
 0x1ab   : > { %v1020_v47 = vadd.f32 %v1019_v40, %v1018_v50  ;;  %v1920_v46 = vpop.eup %1919  ;;  %v1031_v26 = vsel %vm799_vm0, %v1918_v52, 0.0  ;;  %v2985_v49 = vpop.f32.mrf.mxu0  ;;  %v1365_v40 = vld [vmem:[#allocation11 + $0x58] sm:$0xff] }
 0x1ac   : > { %v1922_v1 = vpop.eup %1921  ;;  %v1033_v33 = vsel %vm799_vm0, %v1920_v46, 0.0  ;;  %1375 = vmatpush.msrb.mxu2 %v1365_v40 }
 0x1ad   : > { %v1022_v24 = vadd.f32 %v1021_v22, %v1020_v47  ;;  %1146 = vperm.xlu0 %1856, %v2936_v42   ;;  %v1924_v41 = vpop.eup %1923  ;;  %v1364_v47 = vld [vmem:[#allocation11 + $0x50] sm:$0xff] }
 0x1ae   : > { %v973_v11 = vmul.f32 %v1924_v41, %v972_v8  ;;  %1376 = vmatpush.msrb.mxu2 %v1364_v47 }
 0x1af   : > { %v1024_v45 = vadd.f32 %v1023_v59, %v1022_v24  ;;  %1151 = vperm.xlu1 %1857, %v1898_v54   ;;  %v1035_v54 = vsel %vm799_vm0, %v1922_v1, 0.0  ;;  %v3016_v24 = vperm.slane %v2569_v15, 0 }
 0x1b1   : > { %v1026_v23 = vadd.f32 %v1025_v58, %v1024_v45  ;;  %1156 = vperm.xlu2 %1858, %v1900_v62   ;;  %v459_v45 = vadd.f32 %v2870_v14, %v3016_v24  ;;  %v462_v58 = vadd.f32 %v2889_v38, %v3016_v24  ;;  %v465_v15 = vadd.f32 %v2911_v34, %v3016_v24 }
 0x1b2   : > { %v471_v14 = vadd.f32 %v2953_v28, %v3016_v24 }
 0x1b3   : > { %v1028_v21 = vadd.f32 %v1027_v10, %v1026_v23  ;;  %v2994_v35 = vpop.f32.mrf.mxu0 }
 0x1b5   : > { %v1030_v57 = vadd.f32 %v1029_v7, %v1028_v21  ;;  %1161 = vperm.xlu0 %1856, %v2949_v61   ;;  %v2997_v61 = vpop.f32.mrf.mxu2 }
 0x1b7   : > { %v1032_v25 = vadd.f32 %v1031_v26, %v1030_v57  ;;  %1166 = vperm.xlu1 %1857, %v1904_v18  }
 0x1b9   : > { %v1034_v4 = vadd.f32 %v1033_v33, %v1032_v25  ;;  %1171 = vperm.xlu2 %1858, %v1906_v30   ;;  %v1362_v25 = vld [vmem:[#allocation11 + $0x40] sm:$0xff]  ;;  %v474_v33 = vadd.f32 %v2975_v43, %v3016_v24 }
 0x1bb   : > { %v1036_v0 = vadd.f32 %v1035_v54, %v1034_v4  ;;  %v2999_v5 = vpop.f32.mrf.mxu0 }
 0x1bc   : > { %v483_v39 = vadd.f32 %v2999_v5, %v3016_v24 }
 0x1bd   : > { %v1037_v42 = vrot.slane %v1036_v0, 4  ;;  %1176 = vperm.xlu0 %1856, %v1908_v48   ;;  %v3001_v9 = vpop.f32.mrf.mxu2 }
 0x1bf   : > { %v1038_v32 = vadd.f32 %v1037_v42, %v1036_v0  ;;  %1181 = vperm.xlu1 %1857, %v1910_v60   ;;  %v1329_v42 = vlaneseq }
 0x1c1   : > { %v1039_v20 = vrot.slane %v1038_v32, 2  ;;  %1186 = vperm.xlu2 %1858, %v1912_v29   ;;  %v3042_v43 = vand.u32 127, %v1329_v42 }
 0x1c3   : > { %v1040_v62 = vadd.f32 %v1039_v20, %v1038_v32  ;;  %v3003_v31 = vpop.f32.mrf.mxu0  ;;  %vm1487_vm2 = vcmp.lt.s32.totalorder %v3042_v43, 8  ;;  %vm1391_vm8 = vcmp.lt.s32.totalorder %v3042_v43, 16 }
 0x1c5   : > { %v1041_v56 = vrot.slane %v1040_v62, 1  ;;  %1191 = vperm.xlu0 %1856, %v1914_v13   ;;  %v3005_v36 = vpop.f32.mrf.mxu2  ;;  %v1363_v13 = vld [vmem:[#allocation11 + $0x48] sm:$0xff] }
 0x1c6   : > { %1377 = vmatpush.msrb.mxu2 %v1363_v13 }
 0x1c7   : > { %v1042_v63 = vadd.f32 %v1041_v56, %v1040_v62  ;;  %1196 = vperm.xlu1 %1857, %v1916_v27  }
 0x1c8   : > { %1378 = vmatpush.msrb.mxu2 %v1362_v25 }
 0x1c9   : > { %v1043_v16 = vadd.f32 %v1042_v63, %v973_v11  ;;  %1201 = vperm.xlu2 %1858, %v1918_v52  }
 0x1cb   : > { %1045 = vst.msk [vmem:[#allocation3] sm:$0x1] %vm366_vm1, %v1043_v16  ;;  %v488_v37 = vpop.f32.mrf.mxu0  ;;  %v1361_v16 = vld [vmem:[#allocation11 + $0x38] sm:$0xff] }
 0x1cc   : > { %1379 = vmatpush.msrb.mxu2 %v1361_v16 }
 0x1cd   : > { %1206 = vperm.xlu0 %1856, %v1920_v46   ;;  %v3007_v17 = vpop.f32.mrf.mxu2  ;;  %v468_v46 = vadd.f32 %v2932_v3, %v3016_v24  ;;  %v477_v3 = vadd.f32 %v2985_v49, %v3016_v24  ;;  %v486_v49 = vadd.f32 %v3003_v31, %v3016_v24 }
 0x1cf   : > { %1211 = vperm.xlu1 %1857, %v1922_v1  }
 0x1d2   : > { %v1332_v18 = vld [vmem:[#allocation3] sm:$0x1] }
 0x1d3   : > { %1335 = vperm.xlu2 %1858, %v1332_v18   ;;  %v3009_v50 = vpop.f32.mrf.mxu0 }
 0x1d4   : > { %v492_v13 = vadd.f32 %v3009_v50, %v3016_v24 }
 0x1d5   : > { %1049 = vperm.xlu0 %1856, %v1924_v41   ;;  %v3011_v6 = vpop.f32.mrf.mxu2  ;;  %v480_v41 = vadd.f32 %v2994_v35, %v3016_v24  ;;  %v489_v35 = vadd.f32 %v488_v37, %v3016_v24 }
 0x1db   : > { %v1077_v30 = vpop.permute.xlu2 %1076  ;;  %v3013_v22 = vpop.f32.mrf.mxu0 }
 0x1dc   : > { %v1218_v4 = vmul.f32 %v1077_v30, %v471_v14 }
 0x1dd   : > { %v3024_v27 = vpop.f32.mrf.mxu2 }
 0x1e3   : > { %v1082_v48 = vpop.permute.xlu2 %1081  ;;  %v3026_v10 = vpop.f32.mrf.mxu0 }
 0x1e4   : > { %v1219_v32 = vmul.f32 %v1082_v48, %v474_v33 }
 0x1e5   : > { %v3038_v28 = vpop.f32.mrf.mxu2 }
 0x1eb   : > { %v1097_v60 = vpop.permute.xlu2 %1096  ;;  %v500_v62 = vpop.f32.mrf.mxu0 }
 0x1ec   : > { %v1222_v18 = vmul.f32 %v1097_v60, %v483_v39  ;;  %v501_v14 = vadd.f32 %v500_v62, %v3016_v24 }
 0x1ef   : > { %v1057_v12 = vpop.permute.xlu0 %1056 }
 0x1f0   : > { %v1214_v21 = vmul.f32 %v1057_v12, %v459_v45 }
 0x1f1   : > { %v1067_v29 = vpop.permute.xlu1 %1066 }
 0x1f2   : > { %v1216_v57 = vmul.f32 %v1067_v29, %v465_v15  ;;  %v495_v15 = vadd.f32 %v3013_v22, %v3016_v24 }
 0x1f3   : > { %v3018_v59 = vpop.permute.xlu2 %1111  ;;  %v503_v12 = vpop.f32.mrf.mxu0 }
 0x1f7   : > { %v1062_v52 = vpop.permute.xlu0 %1061 }
 0x1f8   : > { %v1215_v7 = vmul.f32 %v1062_v52, %v462_v58  ;;  %v3054_v58 = vpop.f32.mrf.mxu2  ;;  %v1360_v52 = vld [vmem:[#allocation11 + $0x30] sm:$0xff] }
 0x1f9   : > { %v1072_v23 = vpop.permute.xlu1 %1071  ;;  %1380 = vmatpush.msrb.mxu2 %v1360_v52 }
 0x1fa   : > { %v1246_v26 = vadd.f32 %v1215_v7, %v1214_v21  ;;  %v1217_v38 = vmul.f32 %v1072_v23, %v468_v46  ;;  %v1225_v21 = vmul.f32 %v3018_v59, %v492_v13  ;;  %v498_v46 = vadd.f32 %v3026_v10, %v3016_v24 }
 0x1fb   : > { %v1127_v2 = vpop.permute.xlu2 %1126  ;;  %v506_v33 = vpop.f32.mrf.mxu0 }
 0x1fc   : > { %v1247_v1 = vadd.f32 %v1246_v26, %v1216_v57  ;;  %v1228_v59 = vmul.f32 %v1127_v2, %v501_v14 }
 0x1fe   : > { %v1248_v34 = vadd.f32 %v1247_v1, %v1217_v38 }
 0x1ff   : > { %v1087_v0 = vpop.permute.xlu0 %1086 }
 0x200   : > { %v1249_v20 = vadd.f32 %v1248_v34, %v1218_v4  ;;  %v1220_v56 = vmul.f32 %v1087_v0, %v477_v3  ;;  %v504_v4 = vadd.f32 %v503_v12, %v3016_v24  ;;  %v539_v22 = vpop.f32.mrf.mxu2  ;;  %v507_v0 = vadd.f32 %v506_v33, %v3016_v24 }
 0x201   : > { %v1092_v54 = vpop.permute.xlu1 %1091  ;;  %v525_v12 = vadd.f32 %v3007_v17, %v3016_v24 }
 0x202   : > { %v1250_v8 = vadd.f32 %v1249_v20, %v1219_v32  ;;  %v1221_v11 = vmul.f32 %v1092_v54, %v480_v41  ;;  %v1359_v54 = vld [vmem:[#allocation11 + $0x28] sm:$0xff]  ;;  %v510_v20 = vadd.f32 %v2983_v44, %v3016_v24  ;;  %v519_v44 = vadd.f32 %v3001_v9, %v3016_v24 }
 0x203   : > { %v1142_v40 = vpop.permute.xlu2 %1141  ;;  %1381 = vmatpush.msrb.mxu2 %v1359_v54  ;;  %v528_v9 = vadd.f32 %v3011_v6, %v3016_v24 }
 0x204   : > { %v1251_v63 = vadd.f32 %v1250_v8, %v1220_v56  ;;  %v1231_v8 = vmul.f32 %v1142_v40, %v510_v20  ;;  %v522_v40 = vadd.f32 %v3005_v36, %v3016_v24  ;;  %v531_v36 = vadd.f32 %v3024_v27, %v3016_v24 }
 0x205   : > { %v540_v27 = vadd.f32 %v539_v22, %v3016_v24 }
 0x206   : > { %v1252_v53 = vadd.f32 %v1251_v63, %v1221_v11  ;;  %v1358_v11 = vld [vmem:[#allocation11 + $0x20] sm:$0xff]  ;;  %v513_v63 = vadd.f32 %v2992_v51, %v3016_v24 }
 0x207   : > { %v1102_v48 = vpop.permute.xlu0 %1101  ;;  %1382 = vmatpush.msrb.mxu2 %v1358_v11 }
 0x208   : > { %v1253_v5 = vadd.f32 %v1252_v53, %v1222_v18  ;;  %v1223_v29 = vmul.f32 %v1102_v48, %v486_v49  ;;  %v516_v18 = vadd.f32 %v2997_v61, %v3016_v24 }
 0x209   : > { %v1107_v30 = vpop.permute.xlu1 %1106 }
 0x20a   : > { %v1484_v19 = vpop.f32.mrf.mxu3  ;;  %v1224_v45 = vmul.f32 %v1107_v30, %v489_v35  ;;  %v1254_v31 = vadd.f32 %v1253_v5, %v1223_v29 }
 0x20b   : > { %v1485_v47 = vadd.f32 %v1484_v19, %v1466_v55  ;;  %v1157_v38 = vpop.permute.xlu2 %1156  ;;  %v542_v55 = vpop.f32.mrf.mxu2 }
 0x20c   : > { %v1255_v23 = vadd.f32 %v1254_v31, %v1224_v45  ;;  %v1234_v19 = vmul.f32 %v1157_v38, %v519_v44 }
 0x20d   : > { %v3052_v60 = vsel %vm1487_vm2, %v1485_v47, -1e+30 }
 0x20e   : > { %v1489_v37 = vsel %vm1393_vm3, %v3052_v60, -inf  ;;  %v1256_v57 = vadd.f32 %v1255_v23, %v1225_v21 }
 0x20f   : > { %1490 = vmax.xlane.f32.xlu2 %v1489_v37  ;;  %v1117_v50 = vpop.permute.xlu0 %1116  ;;  %v1357_v37 = vld [vmem:[#allocation11 + $0x18] sm:$0xff] }
 0x210   : > { %v1226_v26 = vmul.f32 %v1117_v50, %v495_v15  ;;  %1383 = vmatpush.msrb.mxu2 %v1357_v37 }
 0x211   : > { %v1122_v7 = vpop.permute.xlu1 %1121 }
 0x212   : > { %v1227_v1 = vmul.f32 %v1122_v7, %v498_v46  ;;  %v1257_v25 = vadd.f32 %v1256_v57, %v1226_v26  ;;  %v534_v7 = vadd.f32 %v3038_v28, %v3016_v24  ;;  %v537_v26 = vadd.f32 %v3054_v58, %v3016_v24 }
 0x213   : > { %v1172_v56 = vpop.permute.xlu2 %1171  ;;  %v545_v61 = vpop.f32.mrf.mxu2  ;;  %v543_v28 = vadd.f32 %v542_v55, %v3016_v24 }
 0x214   : > { %v1258_v34 = vadd.f32 %v1257_v25, %v1227_v1  ;;  %v1237_v52 = vmul.f32 %v1172_v56, %v528_v9  ;;  %v1356_v1 = vld [vmem:[#allocation11 + $0x10] sm:$0xff]  ;;  %v1355_v25 = vld [vmem:[#allocation11 + $0x8] sm:$0xff]  ;;  %v546_v58 = vadd.f32 %v545_v61, %v3016_v24 }
 0x215   : > { %1384 = vmatpush.msrb.mxu2 %v1356_v1 }
 0x216   : > { %v1259_v10 = vadd.f32 %v1258_v34, %v1228_v59  ;;  %v1354_v34 = vld [vmem:[#allocation11] sm:$0xff] }
 0x217   : > { %v1132_v3 = vpop.permute.xlu0 %1131  ;;  %1385 = vmatpush.msrb.mxu2 %v1355_v25 }
 0x218   : > { %v1229_v32 = vmul.f32 %v1132_v3, %v504_v4 }
 0x219   : > { %v1137_v42 = vpop.permute.xlu1 %1136  ;;  %1386 = vmatpush.msrb.mxu2 %v1354_v34 }
 0x21a   : > { %v1230_v62 = vmul.f32 %v1137_v42, %v507_v0  ;;  %v1260_v41 = vadd.f32 %v1259_v10, %v1229_v32 }
 0x21b   : > { %v1187_v47 = vpop.permute.xlu2 %1186  ;;  %v548_v57 = vpop.f32.mrf.mxu2 }
 0x21c   : > { %v1261_v39 = vadd.f32 %v1260_v41, %v1230_v62  ;;  %v1240_v33 = vmul.f32 %v1187_v47, %v537_v26  ;;  %v549_v22 = vadd.f32 %v548_v57, %v3016_v24  ;;  %v1046_v47 = vld [vmem:[#allocation4] sm:$0x1] }
 0x21e   : > { %v1262_v16 = vadd.f32 %v1261_v39, %v1231_v8 }
 0x21f   : > { %v1147_v49 = vpop.permute.xlu0 %1146 }
 0x220   : > { %v1232_v53 = vmul.f32 %v1147_v49, %v513_v63 }
 0x221   : > { %v1152_v2 = vpop.permute.xlu1 %1151 }
 0x222   : > { %v1233_v30 = vmul.f32 %v1152_v2, %v516_v18  ;;  %v1263_v35 = vadd.f32 %v1262_v16, %v1232_v53 }
 0x223   : > { %v1202_v17 = vpop.permute.xlu2 %1201  ;;  %v551_v20 = vpop.f32.mrf.mxu2 }
 0x224   : > { %v1264_v48 = vadd.f32 %v1263_v35, %v1233_v30  ;;  %v1243_v41 = vmul.f32 %v1202_v17, %v546_v58  ;;  %v552_v8 = vadd.f32 %v551_v20, %v3016_v24 }
 0x226   : > { %v1265_v5 = vadd.f32 %v1264_v48, %v1234_v19 }
 0x227   : > { %v1162_v29 = vpop.permute.xlu0 %1161 }
 0x228   : > { %v1235_v13 = vmul.f32 %v1162_v29, %v522_v40 }
 0x229   : > { %v1167_v51 = vpop.permute.xlu1 %1166 }
 0x22a   : > { %v1236_v45 = vmul.f32 %v1167_v51, %v525_v12  ;;  %v1266_v31 = vadd.f32 %v1265_v5, %v1235_v13 }
 0x22c   : > { %v1267_v23 = vadd.f32 %v1266_v31, %v1236_v45 }
 0x22d   : > { %v1336_v59 = vpop.permute.xlu2 %1335 }
 0x22e   : > { %v1268_v50 = vadd.f32 %v1267_v23, %v1237_v52  ;;  %v1338_v32 = vperm.slane %v1336_v59, 0 }
 0x22f   : > { %v1177_v21 = vpop.permute.xlu0 %1176 }
 0x230   : > { %v1238_v46 = vmul.f32 %v1177_v21, %v531_v36  ;;  %1925 = vrcp.f32 %v1338_v32  ;;  %v1350_v61 = vand.u32 2147483648, %v1338_v32  ;;  %vm1344_vm5 = vweird.f32 %v1338_v32 }
 0x231   : > { %v1182_v15 = vpop.permute.xlu1 %1181  ;;  %v1348_v45 = vand.u32 2147483647, %v1338_v32 }
 0x232   : > { %v1239_v14 = vmul.f32 %v1182_v15, %v534_v7  ;;  %v1269_v38 = vadd.f32 %v1268_v50, %v1238_v46  ;;  %v1351_v37 = vor.u32 1.1754944e-38, %v1350_v61  ;;  %v1370_v50 = vld [vmem:[#allocation14 + $0x2] sm:$0x1] }
 0x233   : > { %vm1349_vm7 = vcmp.eq.f32.partialorder %v1348_v45, 8.507059e+37 }
 0x234   : > { %v1270_v6 = vadd.f32 %v1269_v38, %v1239_v14 }
 0x236   : > { %v1271_v0 = vadd.f32 %v1270_v6, %v1240_v33  ;;  %v1926_v49 = vpop.eup %1925 }
 0x237   : > { %v1192_v54 = vpop.permute.xlu0 %1191  ;;  %v1340_v53 = vmul.f32 %v1926_v49, %v1338_v32  ;;  %vm1345_vm4 = vweird.f32 %v1926_v49 }
 0x238   : > { %v1241_v42 = vmul.f32 %v1192_v54, %v540_v27  ;;  %vm1346_vm6 = vmor %vm1344_vm5, %vm1345_vm4 }
 0x239   : > { %v1197_v4 = vpop.permute.xlu1 %1196  ;;  %v1341_v19 = vsub.f32 1.0, %v1340_v53 }
 0x23a   : > { %v1242_v3 = vmul.f32 %v1197_v4, %v543_v28  ;;  %v1272_v10 = vadd.f32 %v1271_v0, %v1241_v42  ;;  %v2224_v0 = vmov 16.0  }
 0x23b   : > { %v1342_v29 = vmul.f32 %v1926_v49, %v1341_v19 }
 0x23c   : > { %v1273_v62 = vadd.f32 %v1272_v10, %v1242_v3 }
 0x23d   : > { %v1343_v13 = vadd.f32 %v1926_v49, %v1342_v29 }
 0x23e   : > { %v1274_v11 = vadd.f32 %v1273_v62, %v1243_v41 }
 0x23f   : > { %v1207_v39 = vpop.permute.xlu0 %1206  ;;  %v1347_v31 = vsel %vm1346_vm6, %v1926_v49, %v1343_v13 }
 0x240   : > { %v1244_v63 = vmul.f32 %v1207_v39, %v549_v22  ;;  %v1352_v23 = vsel %vm1349_vm7, %v1351_v37, %v1347_v31 }
 0x241   : > { %v1212_v56 = vpop.permute.xlu1 %1211 }
 0x242   : > { %v1245_v2 = vmul.f32 %v1212_v56, %v552_v8  ;;  %v1275_v16 = vadd.f32 %v1274_v11, %v1244_v63 }
 0x244   : > { %v1276_v55 = vadd.f32 %v1275_v16, %v1245_v2 }
 0x246   : > { %v1277_v18 = vrot.slane %v1276_v55, 4 }
 0x247   : > { %v1050_v30 = vpop.permute.xlu0 %1049 }
 0x248   : > { %v1278_v44 = vadd.f32 %v1277_v18, %v1276_v55  ;;  %v1052_v40 = vperm.slane %v1050_v30, 0 }
 0x24a   : > { %v1279_v35 = vrot.slane %v1278_v44, 2  ;;  %v1053_v5 = vmul.f32 %v1052_v40, %v1046_v47 }
 0x24c   : > { %v1280_v48 = vadd.f32 %v1279_v35, %v1278_v44 }
 0x24e   : > { %v1281_v51 = vrot.slane %v1280_v48, 1 }
 0x250   : > { %v1282_v24 = vadd.f32 %v1281_v51, %v1280_v48 }
 0x252   : > { %v1283_v12 = vadd.f32 %v1282_v24, %v1053_v5 }
 0x254   : > { %1284 = vst [vmem:[#allocation4] sm:$0x1] %v1283_v12 }
 0x25b   : > { %v1331_v9 = vld [vmem:[#allocation4] sm:$0x1] }
 0x25c   : > { %v1353_v36 = vmul.f32 %v1352_v23, %v1331_v9 }
 0x25e   : > { %1387 = vmatmul.f32.vlgmr.msrb.gmra.mxu2 %v1353_v36 }
 0x282   : > { %v1491_v52 = vpop.xlane.xlu2 %1490 }
 0x283   : > { %v1492_v15 = vsub.f32 %v3052_v60, %v1491_v52 }
 0x285   : > { %v1493_v21 = vmul.f32 1.442695, %v1492_v15 }
 0x287   : > { %1927 = vpow2.f32 %v1493_v21 }
 0x28d   : > { %v1928_v7 = vpop.eup %1927 }
 0x28e   : > { %v1495_v17 = vsel %vm1393_vm3, %v1928_v7, 0.0 }
 0x28f   : > { %1496 = vadd.xlane.f32.xlu2 %v1495_v17 }
 0x2e1   : > { %v1388_v46 = vpop.f32.mrf.mxu2 }
 0x2e2   : > { %v1389_v57 = vadd.f32 %v1388_v46, %v1370_v50 }
 0x2e4   : > { %v1392_v26 = vsel %vm1391_vm8, %v1389_v57, 0.0 }
 0x2e5   : > { %v1394_v14 = vsel %vm1393_vm3, %v1392_v26, 0.0 }
 0x2e6   : > { %1395 = vadd.xlane.f32.xlu1 %v1394_v14 }
 0x302   : > { %v1497_v38 = vpop.xlane.xlu2 %1496 }
 0x303   : > { %1929 = vrcp.f32 %v1497_v38  ;;  %v1509_v1 = vand.u32 2147483648, %v1497_v38  ;;  %vm1503_vm9 = vweird.f32 %v1497_v38  ;;  %v1507_v27 = vand.u32 2147483647, %v1497_v38 }
 0x304   : > { %1931 = vrcp.f32 %v2224_v0 }
 0x305   : > { %v1510_v4 = vor.u32 1.1754944e-38, %v1509_v1  ;;  %vm1508_vm12 = vcmp.eq.f32.partialorder %v1507_v27, 8.507059e+37 }
 0x309   : > { %v1930_v60 = vpop.eup %1929 }
 0x30a   : > { %v1499_v6 = vmul.f32 %v1930_v60, %v1497_v38  ;;  %vm1504_vm10 = vweird.f32 %v1930_v60  ;;  %v1932_v42 = vpop.eup %1931 }
 0x30b   : > { %vm1505_vm11 = vmor %vm1503_vm9, %vm1504_vm10  ;;  %v1398_v58 = vmul.f32 16.0, %v1932_v42  ;;  %vm1402_vm13 = vweird.f32 %v1932_v42 }
 0x30c   : > { %v1500_v25 = vsub.f32 1.0, %v1499_v6 }
 0x30d   : > { %v1399_v3 = vsub.f32 1.0, %v1398_v58 }
 0x30e   : > { %v1501_v33 = vmul.f32 %v1930_v60, %v1500_v25 }
 0x30f   : > { %v1400_v10 = vmul.f32 %v1932_v42, %v1399_v3 }
 0x310   : > { %v1502_v34 = vadd.f32 %v1930_v60, %v1501_v33 }
 0x311   : > { %v1401_v32 = vadd.f32 %v1932_v42, %v1400_v10 }
 0x312   : > { %v1506_v54 = vsel %vm1505_vm11, %v1930_v60, %v1502_v34 }
 0x313   : > { %v1511_v28 = vsel %vm1508_vm12, %v1510_v4, %v1506_v54  ;;  %v1403_v20 = vsel %vm1402_vm13, %v1932_v42, %v1401_v32 }
 0x314   : > { %v1512_v59 = vmul.f32 %v1928_v7, %v1511_v28 }
 0x316   : > { %1513 = vst [vmem:[%s360_s1] sm:$0x1] %v1512_v59 }
 0x359   : > { %v1396_v62 = vpop.xlane.xlu1 %1395 }
 0x35a   : > { %v1404_v41 = vmul.f32 %v1403_v20, %v1396_v62 }
 0x35c   : > { %v1405_v22 = vsub.f32 %v1389_v57, %v1404_v41 }
 0x35e   : > { %v1406_v8 = vmul.f32 %v1405_v22, %v1405_v22 }
 0x360   : > { %v1407_v56 = vsel %vm1391_vm8, %v1406_v8, 0.0 }
 0x361   : > { %v1408_v39 = vsel %vm1393_vm3, %v1407_v56, 0.0 }
 0x362   : > { %1409 = vadd.xlane.f32.xlu0 %v1408_v39 }
 0x363   : > { %2116 = shalt.err (!%p2113_p0)
}
 0x364   : > { %1759 = dma.vmem_to_hbm [thread:$0]  (%p2360_p2), %s1543_s30, 16, %s1545_s11, %s1519_s15   ;;  %v1424_v44 = vld [vmem:[#allocation14 + $0x3] sm:$0x1]  ;;  %v1426_v19 = vld [vmem:[#allocation14 + $0x4] sm:$0x1] }
 0x365   : > { %s1527_s1 = scalar_lea.hbm %s3160_s5, %s2203_s24  ;;  %s354_s2 = scalar_lea.vmem [#allocation15], %s2383_s9 }
 0x366   : > { %s1529_s3 = sshll.u32 %s354_s2, 4  ;;  %s1531_s29 = sshll.u32 %s1527_s1, 4  ;;  %s1530_s3 = int_to_ptr.vmem [resolvable:$true] %s1529_s3  ;;  %s1532_s29 = int_to_ptr.hbm [resolvable:$true] %s1531_s29 }
 0x367   : > { %s1515_s24 = scalar_lea.sflag [#allocation8], %s2383_s9  ;;  %s2131_s30 = sshra.s32 %s1532_s29, 4  ;;  %s2132_s30 = int_to_ptr.hbm [resolvable:$true] %s2131_s30 }
 0x368   : > { %s2133_s11 = scalar_lea.hbm %s2132_s30, 1  ;;  %s2137_s16 = scalar_lea.hbm %s3160_s5, 2 }
 0x369   : > { %p2134_p4 = scmp.ne.s32.totalorder %s2132_s30, %s2133_s11  ;;  %p2138_p9 = scmp.lt.s32.totalorder %s2132_s30, %s3160_s5 }
 0x36a   : > { %p2139_p1 = scmp.lt.s32.totalorder %s2137_s16, %s2133_s11 }
 0x36b   : > { %p2135_p6 = pnand %p2134_p4, %p2360_p2 }
 0x36c   : > { %p2140_p3 = por %p2139_p1, %p2138_p9 }
 0x36d   : > { %p2136_p8 = pneg %p2135_p6 }
 0x36f   : > { %p2141_p7 = pnand %p2140_p3, %p2136_p8 }
 0x3d5   : > { %v1410_v43 = vpop.xlane.xlu0 %1409 }
 0x3d6   : > { %v1411_v11 = vmul.f32 %v1410_v43, %v1403_v20 }
 0x3d8   : > { %v1412_v63 = vadd.f32 1e-05, %v1411_v11 }
 0x3da   : > { %1933 = vrsqrt.f32 %v1412_v63  ;;  %vm1419_vm15 = vweird.f32 %v1412_v63 }
 0x3e0   : > { %v1934_v2 = vpop.eup %1933 }
 0x3e1   : > { %v1414_v16 = vmul.f32 %v1934_v2, %v1412_v63  ;;  %vm1420_vm14 = vweird.f32 %v1934_v2 }
 0x3e2   : > { %vm1421_vm0 = vmor %vm1419_vm15, %vm1420_vm14 }
 0x3e3   : > { %v1415_v55 = vmul.f32 %v1934_v2, %v1414_v16 }
 0x3e5   : > { %v1416_v49 = vmul.f32 0.5, %v1415_v55 }
 0x3e7   : > { %v1417_v18 = vsub.f32 1.5, %v1416_v49 }
 0x3e9   : > { %v1418_v53 = vmul.f32 %v1934_v2, %v1417_v18 }
 0x3eb   : > { %v1422_v30 = vsel %vm1421_vm0, %v1934_v2, %v1418_v53 }
 0x3ec   : > { %v1423_v35 = vmul.f32 %v1422_v30, %v1405_v22 }
 0x3ee   : > { %v1425_v48 = vmul.f32 %v1424_v44, %v1423_v35 }
 0x3f0   : > { %v1427_v40 = vadd.f32 %v1426_v19, %v1425_v48 }
 0x3f2   : > { %v1704_v47 = vmul.f32 -1.442695, %v1427_v40 }
 0x3f4   : > { %1935 = vpow2.f32 %v1704_v47 }
 0x3fa   : > { %v1936_v51 = vpop.eup %1935 }
 0x3fb   : > { %v1431_v24 = vadd.f32 1.0, %v1936_v51 }
 0x3fd   : > { %1937 = vrcp.f32 %v1431_v24  ;;  %v1443_v13 = vand.u32 2147483648, %v1431_v24  ;;  %v1441_v45 = vand.u32 2147483647, %v1431_v24  ;;  %vm1437_vm2 = vweird.f32 %v1431_v24 }
 0x3ff   : > { %v1444_v37 = vor.u32 1.1754944e-38, %v1443_v13  ;;  %vm1442_vm4 = vcmp.eq.f32.partialorder %v1441_v45, 8.507059e+37 }
 0x403   : > { %v1938_v5 = vpop.eup %1937 }
 0x404   : > { %v1433_v29 = vmul.f32 %v1938_v5, %v1431_v24  ;;  %vm1438_vm1 = vweird.f32 %v1938_v5 }
 0x405   : > { %vm1439_vm3 = vmor %vm1437_vm2, %vm1438_vm1 }
 0x406   : > { %v1434_v12 = vsub.f32 1.0, %v1433_v29 }
 0x408   : > { %v1435_v61 = vmul.f32 %v1938_v5, %v1434_v12 }
 0x40a   : > { %v1436_v31 = vadd.f32 %v1938_v5, %v1435_v61 }
 0x40c   : > { %v1440_v9 = vsel %vm1439_vm3, %v1938_v5, %v1436_v31 }
 0x40d   : > { %v1445_v23 = vsel %vm1442_vm4, %v1444_v37, %v1440_v9 }
 0x40e   : > { %1447 = vst [vmem:[%s354_s2] sm:$0x1] %v1445_v23 }
 0x40f   : > { %2144 = shalt.err (!%p2141_p7)
}
 0x410   : > { %1758 = dma.vmem_to_hbm [thread:$0]  (%p2360_p2), %s1530_s3, 16, %s1532_s29, %s1515_s24  }
 0x411 PF: > { %s1556_s9 = sand.u32 1, %s2191_s21   ;;  %p1780_p11 = pnand %p1694_p10, %p2307_p5 }
 0x412   : > { %s1557_s8 = scalar_lea.sflag [#allocation8], %s1556_s9 }
 0x413   : > { %p1781_p12 = pneg %p1780_p11 }
 0x415   : > { %2182 = dma.done.wait (%p1781_p12), %s1557_s8, 16  }
 0x416   : > { %2184 = vsyncadd (%p1781_p12), %s1557_s8, 4294967280  ;;  %s1566_s17 = scalar_lea.sflag [#allocation17], %s1556_s9 }
 0x417   : > { %2186 = dma.done.wait (%p1781_p12), %s1566_s17, 16  }
 0x418   : > { %2188 = vsyncadd (%p1781_p12), %s1566_s17, 4294967280  ;;  %s28_s26 = sadd.s32 1, %s2211_s26   ;;  %s3180_s21 = smov %s2195_s22 }
 0x419   : > { %p25_p13 = scmp.ge.s32.totalorder %s28_s26, 4   ;;  %s3181_s22 = smov %s2199_s23 }
 0x41a   : > { %s3182_s23 = smov %s2370_s18  ;;  %s3183_s24 = smov %s2207_s25 }
 0x41b   : > { %s3184_s25 = smov %s3186_s28  ;;  %27 = sbr.rel (!%p25_p13) target bundleno = 14 (0xe), region = 126 }
 0x420   :  { %1571 = vsyncpa [#allocation7], 1 }
 0x421   :  { %1573 = vsyncpa [#allocation7 + $0x1], 1 }
 0x422   :  { %1574 = vsyncpa [#allocation10], 1 }
 0x423   :  { %1575 = vsyncpa [#allocation13], 1 }
 0x424   :  { %1576 = vsyncpa [#allocation8], 1 }
 0x425   :  { %1578 = vsyncpa [#allocation8 + $0x1], 1 }
 0x426   :  { %1579 = vsyncpa [#allocation17], 1 }
 0x427   :  { %1581 = vsyncpa [#allocation17 + $0x1], 1 }

</bundles_post_ra>
